<compile_context>
chip_gen: v7x
topology: tpu7x:2x2x1
jax: 0.10.0
libtpu: 0.0.40
codegen_flags: <defaults>
</compile_context>

<pallas_src>
import jax
import jax.numpy as jnp
from jax.experimental import pallas as pl
from jax.experimental.pallas import tpu as pltpu

# ---------------- model dimensions (small, sublane/lane friendly) ------------
NUM_NODES = 256      # total graph nodes N
EID_NUM = 128        # rows of init_emb (nodes with pretrained embeddings)
EID_DIM = 32         # pretrained embedding width
IN_CH = 32           # in_channels
HIDDEN_CH = 64       # hidden_channels
OUT_CH = 32          # out_channels


# ---------------- fused kernel -------------------------------------------------
def _ehrgnn_fused_kernel(init_emb_ref, wf_ref, bf_ref, s_emb_ref, w1_ref,
                         adj_ref, b1_ref, w2_ref, b2_ref, out_ref, z_ref):
    """Full forward pass: features -> GCN layer 1 (+ReLU) -> GCN layer 2.

    z_ref is a (N, hidden) VMEM scratch holding Z1 = X @ W1.
    """
    # --- Z1 = X @ W1, written half by half (static, sublane-aligned slices) ---
    e = init_emb_ref.shape[0]
    # eid half: (init_emb @ map_w + map_b) @ w1 == init_emb @ W_fused + b_fused
    z_ref[0:e, :] = (jnp.dot(init_emb_ref[...], wf_ref[...],
                             preferred_element_type=jnp.float32) + bf_ref[...])
    # snp half: s_embedding.weight @ w1
    z_ref[e:, :] = jnp.dot(s_emb_ref[...], w1_ref[...],
                           preferred_element_type=jnp.float32)

    # --- normalization: dinv = 1/sqrt(deg), deg = rowsum(A) + 1 (self-loop) ---
    adj = adj_ref[...]                                        # (N, N) f32
    deg = jnp.sum(adj, axis=1, keepdims=True) + 1.0           # (N, 1) lane reduce
    dinv = jax.lax.rsqrt(deg)                                 # (N, 1), deg >= 1

    # --- layer 1: h = relu( D^-1/2 (A+I) D^-1/2 Z1 + b1 ) ---------------------
    z1s = dinv * z_ref[...]                                   # (N, hidden)
    h = dinv * (jnp.dot(adj, z1s, preferred_element_type=jnp.float32) + z1s)
    h = jnp.maximum(h + b1_ref[...], 0.0)
    # dropout: eval-mode identity

    # --- layer 2: out = D^-1/2 (A+I) D^-1/2 (h @ W2) + b2 ---------------------
    y = jnp.dot(h, w2_ref[...], preferred_element_type=jnp.float32)  # (N, out)
    ys = dinv * y
    out_ref[...] = (dinv * (jnp.dot(adj, ys, preferred_element_type=jnp.float32)
                            + ys) + b2_ref[...])


# ---------------- wrapper ------------------------------------------------------
def ehrgnn_forward_pallas(init_emb, s_emb, adj, params):
    n = adj.shape[0]
    hidden = params["w1"].shape[1]
    out_ch = params["w2"].shape[1]

    # Pre-compose the feature map with the layer-1 projection (tiny dots).
    w_fused = params["map_w"] @ params["w1"]          # (eid_dim, hidden)
    b_fused = params["map_b"] @ params["w1"]          # (1, hidden)

    vmem = pl.BlockSpec(memory_space=pltpu.MemorySpace.VMEM)
    out = pl.pallas_call(
        _ehrgnn_fused_kernel,
        out_shape=jax.ShapeDtypeStruct((n, out_ch), jnp.float32),
        in_specs=[vmem] * 9,
        out_specs=vmem,
        scratch_shapes=[pltpu.VMEM((n, hidden), jnp.float32)],
    )(init_emb, w_fused, b_fused, s_emb, params["w1"], adj,
      params["b1"], params["w2"], params["b2"])
    return out


# ---------------- pure-JAX reference (mirrors the PyTorch forward) -------------
def ehrgnn_forward_reference(init_emb, s_emb, adj, params):
    eid_x = init_emb @ params["map_w"] + params["map_b"]
    x = jnp.concatenate([eid_x, s_emb], axis=0)
    n = adj.shape[0]
    a = adj + jnp.eye(n, dtype=jnp.float32)
    dinv = 1.0 / jnp.sqrt(jnp.sum(a, axis=1))
    a_hat = dinv[:, None] * a * dinv[None, :]
    h1 = jnp.maximum(a_hat @ (x @ params["w1"]) + params["b1"], 0.0)
    # dropout: eval-mode identity
    return a_hat @ (h1 @ params["w2"]) + params["b2"]


# ---------------- deterministic synthetic parameters / inputs ------------------
def init_params(key):
    keys = iter(jax.random.split(key, 16))

    def rnd(shape, scale=0.1):
        return jax.random.normal(next(keys), shape, jnp.float32) * scale

    p = {}
    p["map_w"] = rnd((EID_DIM, IN_CH))          # nn.Linear(eid_dim, in_ch), (in,out)
    p["map_b"] = rnd((1, IN_CH))
    p["w1"] = rnd((IN_CH, HIDDEN_CH))           # GCNConv1 weight, (in,out)
    p["b1"] = rnd((1, HIDDEN_CH))
    p["w2"] = rnd((HIDDEN_CH, OUT_CH))          # GCNConv2 weight, (in,out)
    p["b2"] = rnd((1, OUT_CH))
    return p


if __name__ == "__main__":
    key = jax.random.PRNGKey(0)
    kp, ke, ks, ka = jax.random.split(key, 4)

    params = init_params(kp)
    init_emb = jax.random.normal(ke, (EID_NUM, EID_DIM), jnp.float32)
    # s_embedding(arange(num_nodes - eid_num)) == the full embedding table
    s_emb = jax.random.normal(ks, (NUM_NODES - EID_NUM, IN_CH), jnp.float32) * 0.1

    # dense symmetric 0/1 adjacency, no self-loops (GCN norm adds them)
    a_rand = jax.random.bernoulli(ka, 0.05, (NUM_NODES, NUM_NODES)).astype(jnp.float32)
    adj = jnp.maximum(a_rand, a_rand.T) * (1.0 - jnp.eye(NUM_NODES, dtype=jnp.float32))

    out = ehrgnn_forward_pallas(init_emb, s_emb, adj, params)
    out = jax.block_until_ready(out)

    ref = ehrgnn_forward_reference(init_emb, s_emb, adj, params)

    assert out.shape == (NUM_NODES, OUT_CH), out.shape
    assert bool(jnp.all(jnp.isfinite(out)))
    assert bool(jnp.allclose(out, ref, atol=1e-3, rtol=1e-3))

    print("KERNEL_OK")
</pallas_src>

<mosaic_0001>
module attributes {stable_mosaic.version = 11 : i64} {
  func.func @_ehrgnn_fused_kernel(%arg0: memref<128x32xf32, #tpu.memory_space<vmem>>, %arg1: memref<32x64xf32, #tpu.memory_space<vmem>>, %arg2: memref<1x64xf32, #tpu.memory_space<vmem>>, %arg3: memref<128x32xf32, #tpu.memory_space<vmem>>, %arg4: memref<32x64xf32, #tpu.memory_space<vmem>>, %arg5: memref<256x256xf32, #tpu.memory_space<vmem>>, %arg6: memref<1x64xf32, #tpu.memory_space<vmem>>, %arg7: memref<64x32xf32, #tpu.memory_space<vmem>>, %arg8: memref<1x32xf32, #tpu.memory_space<vmem>>, %arg9: memref<256x32xf32, #tpu.memory_space<vmem>>, %arg10: memref<256x64xf32, #tpu.memory_space<vmem>>) attributes {dimension_semantics = [], scalar_prefetch = 0 : i64, scratch_operands = 1 : i64, tpu.core_type = #tpu.core_type<tc>} {
    %c0 = arith.constant 0 : index
    %c0_0 = arith.constant 0 : index
    %0 = vector.load %arg0[%c0, %c0_0] : memref<128x32xf32, #tpu.memory_space<vmem>>, vector<128x32xf32>
    %c0_1 = arith.constant 0 : index
    %c0_2 = arith.constant 0 : index
    %1 = vector.load %arg1[%c0_1, %c0_2] : memref<32x64xf32, #tpu.memory_space<vmem>>, vector<32x64xf32>
    %cst = arith.constant dense<0.000000e+00> : vector<128x64xf32>
    %2 = tpu.matmul %0, %1, %cst {dimension_numbers = #tpu.dot_dimension_numbers<[1], [0], [0], [1], [0, 0, 1, 1], [], []>} : vector<128x32xf32>, vector<32x64xf32>, vector<128x64xf32> -> vector<128x64xf32>
    %c0_3 = arith.constant 0 : index
    %c0_4 = arith.constant 0 : index
    %3 = vector.load %arg2[%c0_3, %c0_4] : memref<1x64xf32, #tpu.memory_space<vmem>>, vector<1x64xf32>
    %4 = vector.broadcast %3 : vector<1x64xf32> to vector<128x64xf32>
    %5 = arith.addf %2, %4 : vector<128x64xf32>
    %c0_5 = arith.constant 0 : index
    %c0_6 = arith.constant 0 : index
    %6 = vector.load %arg10[%c0_5, %c0_6] : memref<256x64xf32, #tpu.memory_space<vmem>>, vector<128x64xf32>
    tpu.vector_store %arg10[%c0_5, %c0_6], %5 {strides = array<i32>} : memref<256x64xf32, #tpu.memory_space<vmem>>, vector<128x64xf32>,
    %c0_7 = arith.constant 0 : index
    %c0_8 = arith.constant 0 : index
    %7 = vector.load %arg3[%c0_7, %c0_8] : memref<128x32xf32, #tpu.memory_space<vmem>>, vector<128x32xf32>
    %c0_9 = arith.constant 0 : index
    %c0_10 = arith.constant 0 : index
    %8 = vector.load %arg4[%c0_9, %c0_10] : memref<32x64xf32, #tpu.memory_space<vmem>>, vector<32x64xf32>
    %cst_11 = arith.constant dense<0.000000e+00> : vector<128x64xf32>
    %9 = tpu.matmul %7, %8, %cst_11 {dimension_numbers = #tpu.dot_dimension_numbers<[1], [0], [0], [1], [0, 0, 1, 1], [], []>} : vector<128x32xf32>, vector<32x64xf32>, vector<128x64xf32> -> vector<128x64xf32>
    %c128 = arith.constant 128 : index
    %c0_12 = arith.constant 0 : index
    %10 = vector.load %arg10[%c128, %c0_12] : memref<256x64xf32, #tpu.memory_space<vmem>>, vector<128x64xf32>
    tpu.vector_store %arg10[%c128, %c0_12], %9 {strides = array<i32>} : memref<256x64xf32, #tpu.memory_space<vmem>>, vector<128x64xf32>,
    %c0_13 = arith.constant 0 : index
    %c0_14 = arith.constant 0 : index
    %11 = vector.load %arg5[%c0_13, %c0_14] : memref<256x256xf32, #tpu.memory_space<vmem>>, vector<256x256xf32>
    %cst_15 = arith.constant dense<0.000000e+00> : vector<256xf32>
    %12 = vector.multi_reduction <add>, %11, %cst_15 [1] : vector<256x256xf32> to vector<256xf32>
    %13 = vector.shape_cast %12 : vector<256xf32> to vector<256x1xf32>
    %cst_16 = arith.constant 1.000000e+00 : f32
    %14 = vector.broadcast %cst_16 : f32 to vector<256x1xf32>
    %15 = arith.addf %13, %14 : vector<256x1xf32>
    %16 = math.rsqrt %15 : vector<256x1xf32>
    %c0_17 = arith.constant 0 : index
    %c0_18 = arith.constant 0 : index
    %17 = vector.load %arg10[%c0_17, %c0_18] : memref<256x64xf32, #tpu.memory_space<vmem>>, vector<256x64xf32>
    %18 = vector.broadcast %16 : vector<256x1xf32> to vector<256x64xf32>
    %19 = arith.mulf %18, %17 : vector<256x64xf32>
    %cst_19 = arith.constant dense<0.000000e+00> : vector<256x64xf32>
    %20 = tpu.matmul %11, %19, %cst_19 {dimension_numbers = #tpu.dot_dimension_numbers<[1], [0], [0], [1], [0, 0, 1, 1], [], []>} : vector<256x256xf32>, vector<256x64xf32>, vector<256x64xf32> -> vector<256x64xf32>
    %21 = arith.addf %20, %19 : vector<256x64xf32>
    %22 = vector.broadcast %16 : vector<256x1xf32> to vector<256x64xf32>
    %23 = arith.mulf %22, %21 : vector<256x64xf32>
    %c0_20 = arith.constant 0 : index
    %c0_21 = arith.constant 0 : index
    %24 = vector.load %arg6[%c0_20, %c0_21] : memref<1x64xf32, #tpu.memory_space<vmem>>, vector<1x64xf32>
    %25 = vector.broadcast %24 : vector<1x64xf32> to vector<256x64xf32>
    %26 = arith.addf %23, %25 : vector<256x64xf32>
    %cst_22 = arith.constant 0.000000e+00 : f32
    %27 = vector.broadcast %cst_22 : f32 to vector<256x64xf32>
    %28 = arith.maximumf %26, %27 : vector<256x64xf32>
    %c0_23 = arith.constant 0 : index
    %c0_24 = arith.constant 0 : index
    %29 = vector.load %arg7[%c0_23, %c0_24] : memref<64x32xf32, #tpu.memory_space<vmem>>, vector<64x32xf32>
    %cst_25 = arith.constant dense<0.000000e+00> : vector<256x32xf32>
    %30 = tpu.matmul %28, %29, %cst_25 {dimension_numbers = #tpu.dot_dimension_numbers<[1], [0], [0], [1], [0, 0, 1, 1], [], []>} : vector<256x64xf32>, vector<64x32xf32>, vector<256x32xf32> -> vector<256x32xf32>
    %31 = vector.broadcast %16 : vector<256x1xf32> to vector<256x32xf32>
    %32 = arith.mulf %31, %30 : vector<256x32xf32>
    %cst_26 = arith.constant dense<0.000000e+00> : vector<256x32xf32>
    %33 = tpu.matmul %11, %32, %cst_26 {dimension_numbers = #tpu.dot_dimension_numbers<[1], [0], [0], [1], [0, 0, 1, 1], [], []>} : vector<256x256xf32>, vector<256x32xf32>, vector<256x32xf32> -> vector<256x32xf32>
    %34 = arith.addf %33, %32 : vector<256x32xf32>
    %35 = vector.broadcast %16 : vector<256x1xf32> to vector<256x32xf32>
    %36 = arith.mulf %35, %34 : vector<256x32xf32>
    %c0_27 = arith.constant 0 : index
    %c0_28 = arith.constant 0 : index
    %37 = vector.load %arg8[%c0_27, %c0_28] : memref<1x32xf32, #tpu.memory_space<vmem>>, vector<1x32xf32>
    %38 = vector.broadcast %37 : vector<1x32xf32> to vector<256x32xf32>
    %39 = arith.addf %36, %38 : vector<256x32xf32>
    %c0_29 = arith.constant 0 : index
    %c0_30 = arith.constant 0 : index
    %40 = vector.load %arg9[%c0_29, %c0_30] : memref<256x32xf32, #tpu.memory_space<vmem>>, vector<256x32xf32>
    tpu.vector_store %arg9[%c0_29, %c0_30], %39 {strides = array<i32>} : memref<256x32xf32, #tpu.memory_space<vmem>>, vector<256x32xf32>,
    return
  }
}

</mosaic_0001>

<bundles_post_ra>
// kernel: tpu_custom_call.1
= control target key start
LH: loop header
LB: loop body
LE: loop exit
PB: predicated region body
PF: predicated region fallthrough
CT: control target
= control target key end

     0   :  { %14 = vsyncpa [#allocation4], 0  ;;  %s2414_s30 = smov [#allocation3]   ;;  %s3734_s0 = inlined_call_operand.vmem [shape: f32[128,32], index: 0, kind: input, shape index: {}]   ;;  %s3735_s1 = inlined_call_operand.vmem [shape: f32[32,64], index: 1, kind: input, shape index: {}]   ;;  %s3736_s2 = inlined_call_operand.vmem [shape: f32[1,64], index: 2, kind: input, shape index: {}]   ;;  %s3737_s3 = inlined_call_operand.vmem [shape: f32[128,32], index: 3, kind: input, shape index: {}]   ;;  %s3738_s4 = inlined_call_operand.vmem [shape: f32[32,64], index: 4, kind: input, shape index: {}]   ;;  %s3739_s5 = inlined_call_operand.hbm [shape: f32[256,256], index: 5, kind: input, shape index: {}]   ;;  %s3740_s6 = inlined_call_operand.vmem [shape: f32[1,64], index: 6, kind: input, shape index: {}]   ;;  %s3741_s7 = inlined_call_operand.vmem [shape: f32[64,32], index: 7, kind: input, shape index: {}]   ;;  %s3742_s8 = inlined_call_operand.vmem [shape: f32[1,32], index: 8, kind: input, shape index: {}]   ;;  %s3743_s9 = inlined_call_operand.vmem [shape: f32[256,32], index: 9, kind: output, shape index: {}]  }
   0x1   :  { %s30_s10 = sshll.u32 %s2414_s30, 4  ;;  %s2390_s13 = scalar_lea.hbm %s3739_s5, 8192  ;;  %s31_s10 = int_to_ptr.vmem [resolvable:$true] %s30_s10 }
   0x2   :  { %p2391_p0 = scmp.ne.s32.totalorder %s3739_s5, %s2390_s13  ;;  %p2394_p1 = scmp.lt.u32.totalorder %s2390_s13, %s3739_s5 }
   0x4   :  { %p2396_p2 = pnand %p2394_p1, %p2391_p0 }
   0x6   :  { %2399 = shalt.err (!%p2396_p2)
}
   0x7   :  { %s2400_s18 = scalar_lea.vmem %s31_s10, 8192  ;;  %p2405_p4 = scmp.lt.s32.totalorder %s31_s10, %s31_s10 }
   0x8   :  { %p2401_p3 = scmp.ne.s32.totalorder %s31_s10, %s2400_s18  ;;  %p2406_p5 = scmp.lt.s32.totalorder %s2400_s18, %s2400_s18 }
   0xa   :  { %p2407_p6 = por %p2406_p5, %p2405_p4 }
   0xc   :  { %p2408_p7 = pnand %p2407_p6, %p2401_p3 }
   0xe   :  { %2411 = shalt.err (!%p2408_p7)
}
   0xf   :  { %s2415_s19 = smov 256   ;;  %s2416_s20 = smov 16  }
  0x10   :  { %36 = dma.hbm_to_vmem [thread:$0]  %s3739_s5, 8192, %s31_s10, [#allocation4], %s2415_s19, %s2415_s19, %s2416_s20  }
  0x11   :  { %2412 = dma.done.wait [#allocation4], 8192  }
  0x12   :  { %2413 = vsyncadd [#allocation4], 4294959104  ;;  %vm73_vm0 = vcmask 261120   ;;  %v62_v0 = vld [vmem:[%s3735_s1] sm:$0xff]  ;;  %v63_v1 = vld [vmem:[%s3735_s1 + $0x8] sm:$0xff]  ;;  %vm267_vm1 = vcmask 523264  }
  0x13   :  { %v64_v2 = vld [vmem:[%s3735_s1 + $0x10] sm:$0xff]  ;;  %v2098_v3 = vpack.c.bf16 %v63_v1, %v62_v0  ;;  %v65_v4 = vld [vmem:[%s3735_s1 + $0x18] sm:$0xff]  ;;  %v46_v5 = vld [vmem:[%s3734_s0] sm:$0xff] }
  0x14   :  { %v2102_v6 = vpack.c.bf16 %v65_v4, %v64_v2  ;;  %1978 = vmatprep.mubr.msk.f32.mxu0 %vm73_vm0, %v46_v5  ;;  %v300_v7 = vld [vmem:[%s3738_s4] sm:$0xff]  ;;  %v301_v8 = vld [vmem:[%s3738_s4 + $0x8] sm:$0xff]  ;;  %v302_v10 = vld [vmem:[%s3738_s4 + $0x10] sm:$0xff] }
  0x15   :  { %2099 = vmatprep.subr.bf16.mxu0 %v2098_v3  ;;  %v2106_v9 = vpack.c.bf16 %v301_v8, %v300_v7  ;;  %v303_v11 = vld [vmem:[%s3738_s4 + $0x18] sm:$0xff]  ;;  %v47_v12 = vld [vmem:[%s3734_s0 + $0x8] sm:$0xff]  ;;  %v284_v14 = vld [vmem:[%s3737_s3] sm:$0xff] }
  0x16   :  { %2101 = vmatpush3.bf16.msra.mxu0 %v2098_v3  ;;  %v2110_v13 = vpack.c.bf16 %v303_v11, %v302_v10  ;;  %v48_v15 = vld [vmem:[%s3734_s0 + $0x10] sm:$0xff]  ;;  %2010 = vmatprep.mubr.msk.f32.mxu1 %vm73_vm0, %v284_v14  ;;  %v49_v16 = vld [vmem:[%s3734_s0 + $0x18] sm:$0xff]  ;;  %v50_v17 = vld [vmem:[%s3734_s0 + $0x20] sm:$0xff] }
  0x17   :  { %2103 = vmatprep.subr.bf16.mxu0 %v2102_v6  ;;  %2107 = vmatprep.subr.bf16.mxu1 %v2106_v9  ;;  %v285_v18 = vld [vmem:[%s3737_s3 + $0x8] sm:$0xff]  ;;  %v286_v19 = vld [vmem:[%s3737_s3 + $0x10] sm:$0xff]  ;;  %v2532_v20 = vld [vmem:[#allocation3] sm:$0xff] }
  0x18   :  { %2109 = vmatpush3.bf16.msra.mxu1 %v2106_v9  ;;  %v2534_v21 = vld [vmem:[#allocation3 + $0x8] sm:$0xff]  ;;  %v2538_v23 = vld [vmem:[#allocation3 + $0x20] sm:$0xff]  ;;  %v2542_v25 = vld [vmem:[#allocation3 + $0x10] sm:$0xff] }
  0x19   :  { %2111 = vmatprep.subr.bf16.mxu1 %v2110_v13  ;;  %v577_v22 = vadd.f32 %v2534_v21, %v2532_v20  ;;  %v2540_v24 = vld [vmem:[#allocation3 + $0x28] sm:$0xff]  ;;  %v2547_v27 = vld [vmem:[#allocation3 + $0x18] sm:$0xff]  ;;  %v2549_v28 = vld [vmem:[#allocation3 + $0x30] sm:$0xff] }
  0x1a   :  { %2105 = vmatpush3.bf16.msra.mxu0 %v2102_v6  ;;  %v583_v26 = vadd.f32 %v2540_v24, %v2538_v23  ;;  %v2551_v29 = vld [vmem:[#allocation3 + $0x38] sm:$0xff]  ;;  %v51_v30 = vld [vmem:[%s3734_s0 + $0x28] sm:$0xff]  ;;  %v580_v31 = vadd.f32 %v2547_v27, %v2542_v25  ;;  %v52_v32 = vld [vmem:[%s3734_s0 + $0x30] sm:$0xff] }
  0x1b   :  { %578 = vadd.xlane.f32.xlu0 %v577_v22  ;;  %v586_v33 = vadd.f32 %v2551_v29, %v2549_v28  ;;  %v2565_v34 = vld [vmem:[#allocation3 + $0x40] sm:$0xff]  ;;  %v2567_v35 = vld [vmem:[#allocation3 + $0x48] sm:$0xff]  ;;  %v287_v36 = vld [vmem:[%s3737_s3 + $0x18] sm:$0xff] }
  0x1c   :  { %2113 = vmatpush3.bf16.msra.mxu1 %v2110_v13  ;;  %584 = vadd.xlane.f32.xlu1 %v583_v26  ;;  %v2573_v37 = vld [vmem:[#allocation3 + $0x50] sm:$0xff]  ;;  %v2575_v38 = vld [vmem:[#allocation3 + $0x58] sm:$0xff]  ;;  %v288_v39 = vld [vmem:[%s3737_s3 + $0x20] sm:$0xff]  ;;  %v589_v41 = vadd.f32 %v2567_v35, %v2565_v34 }
  0x1d   :  { %1979 = vmatmul.mubr.msk.f32.vlgmr.msra.gmra.mrb[0].mxu0 %vm73_vm0, %v47_v12  ;;  %v53_v40 = vld [vmem:[%s3734_s0 + $0x38] sm:$0xff]  ;;  %v54_v42 = vld [vmem:[%s3734_s0 + $0x40] sm:$0xff]  ;;  %v592_v43 = vadd.f32 %v2575_v38, %v2573_v37  ;;  %v2595_v45 = vld [vmem:[#allocation3 + $0x68] sm:$0xff] }
  0x1e   :  { %1981 = vmatprep.mubr.msk.f32.mxu0 %vm73_vm0, %v48_v15  ;;  %v2593_v44 = vld [vmem:[#allocation3 + $0x60] sm:$0xff]  ;;  %v289_v46 = vld [vmem:[%s3737_s3 + $0x28] sm:$0xff]  ;;  %v2601_v47 = vld [vmem:[#allocation3 + $0x70] sm:$0xff] }
  0x1f   :  { %2011 = vmatmul.mubr.msk.f32.vlgmr.msra.gmra.mrb[0].mxu1 %vm73_vm0, %v285_v18  ;;  %581 = vadd.xlane.f32.xlu0 %v580_v31  ;;  %v2603_v48 = vld [vmem:[#allocation3 + $0x78] sm:$0xff]  ;;  %v290_v49 = vld [vmem:[%s3737_s3 + $0x30] sm:$0xff]  ;;  %v55_v50 = vld [vmem:[%s3734_s0 + $0x48] sm:$0xff]  ;;  %v595_v51 = vadd.f32 %v2595_v45, %v2593_v44 }
  0x20   :  { %2013 = vmatprep.mubr.msk.f32.mxu1 %vm73_vm0, %v286_v19  ;;  %587 = vadd.xlane.f32.xlu1 %v586_v33  ;;  %v56_v52 = vld [vmem:[%s3734_s0 + $0x50] sm:$0xff]  ;;  %v598_v53 = vadd.f32 %v2603_v48, %v2601_v47  ;;  %v2621_v54 = vld [vmem:[#allocation3 + $0x80] sm:$0xff]  ;;  %v2623_v55 = vld [vmem:[#allocation3 + $0x88] sm:$0xff] }
  0x21   :  { %1982 = vmatmul.mubr.msk.f32.gmra.mrb[2].mxu0 %vm73_vm0, %v49_v16  ;;  %v291_v56 = vld [vmem:[%s3737_s3 + $0x38] sm:$0xff]  ;;  %v2629_v57 = vld [vmem:[#allocation3 + $0x90] sm:$0xff]  ;;  %v292_v59 = vld [vmem:[%s3737_s3 + $0x40] sm:$0xff]  ;;  %v601_v61 = vadd.f32 %v2623_v55, %v2621_v54 }
  0x22   :  { %1984 = vmatprep.mubr.msk.f32.mxu0 %vm73_vm0, %v50_v17  ;;  %v2631_v58 = vld [vmem:[#allocation3 + $0x98] sm:$0xff]  ;;  %v58_v62 = vld [vmem:[%s3734_s0 + $0x60] sm:$0xff]  ;;  %v2651_v1 = vld [vmem:[#allocation3 + $0xa8] sm:$0xff] }
  0x23   :  { %2014 = vmatmul.mubr.msk.f32.gmra.mrb[2].mxu1 %vm73_vm0, %v287_v36  ;;  %590 = vadd.xlane.f32.xlu0 %v589_v41  ;;  %v57_v60 = vld [vmem:[%s3734_s0 + $0x58] sm:$0xff]  ;;  %v604_v63 = vadd.f32 %v2631_v58, %v2629_v57  ;;  %v2649_v0 = vld [vmem:[#allocation3 + $0xa0] sm:$0xff]  ;;  %v293_v2 = vld [vmem:[%s3737_s3 + $0x48] sm:$0xff] }
  0x24   :  { %2016 = vmatprep.mubr.msk.f32.mxu1 %vm73_vm0, %v288_v39  ;;  %593 = vadd.xlane.f32.xlu1 %v592_v43  ;;  %v2657_v3 = vld [vmem:[#allocation3 + $0xb0] sm:$0xff]  ;;  %v2659_v4 = vld [vmem:[#allocation3 + $0xb8] sm:$0xff]  ;;  %v59_v6 = vld [vmem:[%s3734_s0 + $0x68] sm:$0xff]  ;;  %v607_v7 = vadd.f32 %v2651_v1, %v2649_v0 }
  0x25   :  { %1985 = vmatmul.mubr.msk.f32.gmra.mrb[4].mxu0 %vm73_vm0, %v51_v30  ;;  %v294_v5 = vld [vmem:[%s3737_s3 + $0x50] sm:$0xff]  ;;  %v610_v9 = vadd.f32 %v2659_v4, %v2657_v3  ;;  %v2677_v10 = vld [vmem:[#allocation3 + $0xc0] sm:$0xff]  ;;  %v2679_v11 = vld [vmem:[#allocation3 + $0xc8] sm:$0xff] }
  0x26   :  { %1987 = vmatprep.mubr.msk.f32.mxu0 %vm73_vm0, %v52_v32  ;;  %v60_v8 = vld [vmem:[%s3734_s0 + $0x70] sm:$0xff]  ;;  %v295_v12 = vld [vmem:[%s3737_s3 + $0x58] sm:$0xff]  ;;  %v296_v15 = vld [vmem:[%s3737_s3 + $0x60] sm:$0xff]  ;;  %v613_v17 = vadd.f32 %v2679_v11, %v2677_v10 }
  0x27   :  { %2017 = vmatmul.mubr.msk.f32.gmra.mrb[4].mxu1 %vm73_vm0, %v289_v46  ;;  %596 = vadd.xlane.f32.xlu0 %v595_v51  ;;  %v2685_v13 = vld [vmem:[#allocation3 + $0xd0] sm:$0xff]  ;;  %v2687_v14 = vld [vmem:[#allocation3 + $0xd8] sm:$0xff]  ;;  %v2702_v19 = vld [vmem:[#allocation3 + $0xe0] sm:$0xff] }
  0x28   :  { %2019 = vmatprep.mubr.msk.f32.mxu1 %vm73_vm0, %v290_v49  ;;  %599 = vadd.xlane.f32.xlu1 %v598_v53  ;;  %v61_v16 = vld [vmem:[%s3734_s0 + $0x78] sm:$0xff]  ;;  %v616_v18 = vadd.f32 %v2687_v14, %v2685_v13  ;;  %v2704_v22 = vld [vmem:[#allocation3 + $0xe8] sm:$0xff]  ;;  %v2710_v30 = vld [vmem:[#allocation3 + $0xf0] sm:$0xff] }
  0x29   :  { %1988 = vmatmul.mubr.msk.f32.gmra.mrb[6].mxu0 %vm73_vm0, %v53_v40  ;;  %v297_v26 = vld [vmem:[%s3737_s3 + $0x68] sm:$0xff]  ;;  %v2712_v31 = vld [vmem:[#allocation3 + $0xf8] sm:$0xff]  ;;  %v298_v32 = vld [vmem:[%s3737_s3 + $0x70] sm:$0xff]  ;;  %v619_v33 = vadd.f32 %v2704_v22, %v2702_v19 }
  0x2a   :  { %1990 = vmatprep.mubr.msk.f32.mxu0 %vm73_vm0, %v54_v42  ;;  %v622_v36 = vadd.f32 %v2712_v31, %v2710_v30  ;;  %v2724_v39 = vld [vmem:[#allocation3 + $0x100] sm:$0xff]  ;;  %v2726_v40 = vld [vmem:[#allocation3 + $0x108] sm:$0xff]  ;;  %v299_v41 = vld [vmem:[%s3737_s3 + $0x78] sm:$0xff] }
  0x2b   :  { %2020 = vmatmul.mubr.msk.f32.gmra.mrb[6].mxu1 %vm73_vm0, %v291_v56  ;;  %602 = vadd.xlane.f32.xlu0 %v601_v61  ;;  %v2732_v42 = vld [vmem:[#allocation3 + $0x110] sm:$0xff]  ;;  %v2734_v43 = vld [vmem:[#allocation3 + $0x118] sm:$0xff]  ;;  %v2741_v49 = vld [vmem:[#allocation3 + $0x120] sm:$0xff] }
  0x2c   :  { %2022 = vmatprep.mubr.msk.f32.mxu1 %vm73_vm0, %v292_v59  ;;  %605 = vadd.xlane.f32.xlu1 %v604_v63  ;;  %v628_v46 = vadd.f32 %v2734_v43, %v2732_v42  ;;  %3857 = vst [vmem:[#allocation6_spill] sm:$0xff] %v2741_v49  ;;  %v2745_v51 = vld [vmem:[#allocation3 + $0x130] sm:$0xff]  ;;  %v2753_v59 = vld [vmem:[#allocation3 + $0x140] sm:$0xff] }
  0x2d   :  { %1991 = vmatmul.mubr.msk.f32.gmra.mrb[8].mxu0 %vm73_vm0, %v55_v50  ;;  %v2743_v50 = vld [vmem:[#allocation3 + $0x128] sm:$0xff]  ;;  %3858 = vst [vmem:[#allocation7_spill] sm:$0xff] %v2745_v51  ;;  %3860 = vst [vmem:[#allocation9_spill] sm:$0xff] %v2753_v59  ;;  %v2757_v61 = vld [vmem:[#allocation3 + $0x150] sm:$0xff] }
  0x2e   :  { %1993 = vmatprep.mubr.msk.f32.mxu0 %vm73_vm0, %v56_v52  ;;  %v2747_v52 = vld [vmem:[#allocation3 + $0x138] sm:$0xff]  ;;  %v631_v53 = vadd.f32 %v2743_v50, %v2741_v49  ;;  %3862 = vst [vmem:[#allocation11_spill] sm:$0xff] %v2757_v61 }
  0x2f   :  { %2023 = vmatmul.mubr.msk.f32.gmra.mrb[8].mxu1 %vm73_vm0, %v293_v2  ;;  %608 = vadd.xlane.f32.xlu0 %v607_v7  ;;  %3859 = vst [vmem:[#allocation8_spill] sm:$0xff] %v2747_v52  ;;  %v634_v56 = vadd.f32 %v2747_v52, %v2745_v51  ;;  %v2769_v7 = vld [vmem:[#allocation3 + $0x170] sm:$0xff] }
  0x30   :  { %2025 = vmatprep.mubr.msk.f32.mxu1 %vm73_vm0, %v294_v5  ;;  %611 = vadd.xlane.f32.xlu1 %v610_v9  ;;  %v2765_v5 = vld [vmem:[#allocation3 + $0x160] sm:$0xff]  ;;  %3866 = vst [vmem:[#allocation15_spill] sm:$0xff] %v2769_v7 }
  0x31   :  { %1994 = vmatmul.mubr.msk.f32.gmra.mrb[10].mxu0 %vm73_vm0, %v57_v60  ;;  %v2755_v60 = vld [vmem:[#allocation3 + $0x148] sm:$0xff]  ;;  %3864 = vst [vmem:[#allocation13_spill] sm:$0xff] %v2765_v5 }
  0x32   :  { %1996 = vmatprep.mubr.msk.f32.mxu0 %vm73_vm0, %v58_v62  ;;  %3861 = vst [vmem:[#allocation10_spill] sm:$0xff] %v2755_v60  ;;  %v2759_v62 = vld [vmem:[#allocation3 + $0x158] sm:$0xff]  ;;  %v637_v63 = vadd.f32 %v2755_v60, %v2753_v59 }
  0x33   :  { %2026 = vmatmul.mubr.msk.f32.gmra.mrb[10].mxu1 %vm73_vm0, %v295_v12  ;;  %614 = vadd.xlane.f32.xlu0 %v613_v17  ;;  %3863 = vst [vmem:[#allocation12_spill] sm:$0xff] %v2759_v62  ;;  %v640_v2 = vadd.f32 %v2759_v62, %v2757_v61  ;;  %v2781_v17 = vld [vmem:[#allocation3 + $0x190] sm:$0xff] }
  0x34   :  { %2028 = vmatprep.mubr.msk.f32.mxu1 %vm73_vm0, %v296_v15  ;;  %617 = vadd.xlane.f32.xlu1 %v616_v18  ;;  %v2777_v15 = vld [vmem:[#allocation3 + $0x180] sm:$0xff]  ;;  %3870 = vst [vmem:[#allocation19_spill] sm:$0xff] %v2781_v17  ;;  %v2783_v18 = vld [vmem:[#allocation3 + $0x198] sm:$0xff] }
  0x35   :  { %1997 = vmatmul.mubr.msk.f32.gmra.mrb[12].mxu0 %vm73_vm0, %v59_v6  ;;  %v2767_v6 = vld [vmem:[#allocation3 + $0x168] sm:$0xff]  ;;  %3868 = vst [vmem:[#allocation17_spill] sm:$0xff] %v2777_v15  ;;  %3871 = vst [vmem:[#allocation20_spill] sm:$0xff] %v2783_v18 }
  0x36   :  { %1999 = vmatprep.mubr.msk.f32.mxu0 %vm73_vm0, %v60_v8  ;;  %3865 = vst [vmem:[#allocation14_spill] sm:$0xff] %v2767_v6  ;;  %v2771_v8 = vld [vmem:[#allocation3 + $0x178] sm:$0xff]  ;;  %v643_v9 = vadd.f32 %v2767_v6, %v2765_v5 }
  0x37   :  { %2029 = vmatmul.mubr.msk.f32.gmra.mrb[12].mxu1 %vm73_vm0, %v297_v26  ;;  %620 = vadd.xlane.f32.xlu0 %v619_v33  ;;  %3867 = vst [vmem:[#allocation16_spill] sm:$0xff] %v2771_v8  ;;  %v646_v12 = vadd.f32 %v2771_v8, %v2769_v7  ;;  %v2789_v33 = vld [vmem:[#allocation3 + $0x1a0] sm:$0xff] }
  0x38   :  { %2031 = vmatprep.mubr.msk.f32.mxu1 %vm73_vm0, %v298_v32  ;;  %623 = vadd.xlane.f32.xlu1 %v622_v36  ;;  %v652_v32 = vadd.f32 %v2783_v18, %v2781_v17  ;;  %3872 = vst [vmem:[#allocation21_spill] sm:$0xff] %v2789_v33  ;;  %v2791_v36 = vld [vmem:[#allocation3 + $0x1a8] sm:$0xff] }
  0x39   :  { %2000 = vmatmul.mubr.msk.f32.gmra.mrb[14].mxu0 %vm73_vm0, %v61_v16  ;;  %v2779_v16 = vld [vmem:[#allocation3 + $0x188] sm:$0xff]  ;;  %3873 = vst [vmem:[#allocation22_spill] sm:$0xff] %v2791_v36 }
  0x3a   :  { %865 = vmatprep.mubr.f32.mxu0 %v2534_v21  ;;  %v625_v21 = vadd.f32 %v2726_v40, %v2724_v39  ;;  %3869 = vst [vmem:[#allocation18_spill] sm:$0xff] %v2779_v16  ;;  %v649_v26 = vadd.f32 %v2779_v16, %v2777_v15 }
  0x3b   :  { %2032 = vmatmul.mubr.msk.f32.gmra.mrb[14].mxu1 %vm73_vm0, %v299_v41  ;;  %v2793_v41 = vld [vmem:[#allocation3 + $0x1b0] sm:$0xff] }
  0x3c   :  { %626 = vadd.xlane.f32.xlu0 %v625_v21  ;;  %629 = vadd.xlane.f32.xlu1 %v628_v46  ;;  %3874 = vst [vmem:[#allocation23_spill] sm:$0xff] %v2793_v41  ;;  %v2795_v21 = vld [vmem:[#allocation3 + $0x1b8] sm:$0xff]  ;;  %v655_v46 = vadd.f32 %v2791_v36, %v2789_v33  ;;  %v2815_v33 = vld [vmem:[#allocation3 + $0x1e8] sm:$0xff] }
  0x3d   :  { %3875 = vst [vmem:[#allocation24_spill] sm:$0xff] %v2795_v21  ;;  %3881 = vst [vmem:[#allocation30_spill] sm:$0xff] %v2815_v33 }
  0x40   :  { %632 = vadd.xlane.f32.xlu0 %v631_v53  ;;  %635 = vadd.xlane.f32.xlu1 %v634_v56  ;;  %v658_v53 = vadd.f32 %v2795_v21, %v2793_v41  ;;  %v2801_v56 = vld [vmem:[#allocation3 + $0x1c0] sm:$0xff]  ;;  %v2817_v41 = vld [vmem:[#allocation3 + $0x1f0] sm:$0xff]  ;;  %v2819_v21 = vld [vmem:[#allocation3 + $0x1f8] sm:$0xff] }
  0x41   :  { %3876 = vst [vmem:[#allocation25_spill] sm:$0xff] %v2801_v56  ;;  %3882 = vst [vmem:[#allocation31_spill] sm:$0xff] %v2817_v41 }
  0x42   :  { %3883 = vst [vmem:[#allocation32_spill] sm:$0xff] %v2819_v21 }
  0x44   :  { %638 = vadd.xlane.f32.xlu0 %v637_v63  ;;  %641 = vadd.xlane.f32.xlu1 %v640_v2  ;;  %v2803_v63 = vld [vmem:[#allocation3 + $0x1c8] sm:$0xff]  ;;  %v2805_v2 = vld [vmem:[#allocation3 + $0x1d0] sm:$0xff] }
  0x45   :  { %3877 = vst [vmem:[#allocation26_spill] sm:$0xff] %v2803_v63  ;;  %3878 = vst [vmem:[#allocation27_spill] sm:$0xff] %v2805_v2 }
  0x48   :  { %644 = vadd.xlane.f32.xlu0 %v643_v9  ;;  %647 = vadd.xlane.f32.xlu1 %v646_v12  ;;  %v2807_v9 = vld [vmem:[#allocation3 + $0x1d8] sm:$0xff]  ;;  %v661_v12 = vadd.f32 %v2803_v63, %v2801_v56 }
  0x49   :  { %3879 = vst [vmem:[#allocation28_spill] sm:$0xff] %v2807_v9 }
  0x4c   :  { %650 = vadd.xlane.f32.xlu0 %v649_v26  ;;  %653 = vadd.xlane.f32.xlu1 %v652_v32  ;;  %v664_v26 = vadd.f32 %v2807_v9, %v2805_v2  ;;  %v2813_v32 = vld [vmem:[#allocation3 + $0x1e0] sm:$0xff] }
  0x4d   :  { %3880 = vst [vmem:[#allocation29_spill] sm:$0xff] %v2813_v32  ;;  %v667_v36 = vadd.f32 %v2815_v33, %v2813_v32 }
  0x50   :  { %656 = vadd.xlane.f32.xlu0 %v655_v46  ;;  %659 = vadd.xlane.f32.xlu1 %v658_v53  ;;  %v670_v46 = vadd.f32 %v2819_v21, %v2817_v41  ;;  %v3759_v53 = vmov 0.0|0.0   ;;  %v2837_v21 = vld [vmem:[%s3736_s2] ss:$0 sm:$0xff] }
  0x51   :  { %2114 = vmatprep.subr.bf16.mxu0 %v3759_v53 }
  0x54   :  { %662 = vadd.xlane.f32.xlu0 %v661_v12  ;;  %665 = vadd.xlane.f32.xlu1 %v664_v26 }
  0x58   :  { %668 = vadd.xlane.f32.xlu0 %v667_v36  ;;  %671 = vadd.xlane.f32.xlu1 %v670_v46 }
  0xa8   :  { %v579_v9 = vpop.xlane.xlu0 %578 }
  0xa9   :  { %v585_v2 = vpop.xlane.xlu1 %584  ;;  %v673_v53 = vadd.f32 1.0, %v579_v9 }
  0xaa   :  { %v675_v61 = vadd.f32 1.0, %v585_v2 }
  0xac   :  { %v582_v63 = vpop.xlane.xlu0 %581 }
  0xad   :  { %v588_v56 = vpop.xlane.xlu1 %587  ;;  %v674_v36 = vadd.f32 1.0, %v582_v63 }
  0xae   :  { %v676_v33 = vadd.f32 1.0, %v588_v56 }
  0xaf   :  { %2262 = vrsqrt.f32 %v674_v36 }
  0xb0   :  { %v591_v17 = vpop.xlane.xlu0 %590  ;;  %2264 = vrsqrt.f32 %v673_v53 }
  0xb1   :  { %v594_v18 = vpop.xlane.xlu1 %593  ;;  %2266 = vrsqrt.f32 %v676_v33  ;;  %v677_v59 = vadd.f32 1.0, %v591_v17 }
  0xb2   :  { %v678_v36 = vadd.f32 1.0, %v594_v18  ;;  %2268 = vrsqrt.f32 %v675_v61 }
  0xb4   :  { %v597_v15 = vpop.xlane.xlu0 %596  ;;  %2270 = vrsqrt.f32 %v678_v36 }
  0xb5   :  { %v600_v12 = vpop.xlane.xlu1 %599  ;;  %2272 = vrsqrt.f32 %v677_v59  ;;  %v679_v17 = vadd.f32 1.0, %v597_v15 }
  0xb6   :  { %v680_v2 = vadd.f32 1.0, %v600_v12 }
  0xb8   :  { %v603_v16 = vpop.xlane.xlu0 %602  ;;  %2274 = vrsqrt.f32 %v680_v2 }
  0xb9   :  { %v606_v7 = vpop.xlane.xlu1 %605  ;;  %v2855_v61 = vpop.eup %2262  ;;  %2276 = vrsqrt.f32 %v679_v17  ;;  %v681_v36 = vadd.f32 1.0, %v603_v16 }
  0xba   :  { %3884 = vst [vmem:[#allocation33_spill] sm:$0xff] %v2855_v61  ;;  %v2861_v15 = vpop.eup %2264 }
  0xbb   :  { %3885 = vst [vmem:[#allocation34_spill] sm:$0xff] %v2861_v15 }
  0xbc   :  { %v2826_v32 = vpop.xlane.xlu0 %608 }
  0xbd   :  { %v2828_v26 = vpop.xlane.xlu1 %611 }
  0xc0   :  { %v2830_v41 = vpop.xlane.xlu0 %614 }
  0xc1   :  { %v2832_v46 = vpop.xlane.xlu1 %617 }
  0xc4   :  { %v2839_v8 = vpop.xlane.xlu0 %620 }
  0xc5   :  { %v2841_v6 = vpop.xlane.xlu1 %623 }
  0xc9   :  { %v2848_v52 = vpop.xlane.xlu0 %626  ;;  %v2851_v33 = vpop.xlane.xlu1 %629 }
  0xf0   :  { %v1980_v5 = vpop.f32.mrb[0].mxu0 }
  0xf1   :  { %v194_v63 = vadd.f32 %v1980_v5, %v2837_v21  ;;  %v188_v62 = vpop.f32.mrb[1].mxu0 }
  0xf2   :  { %v189_v9 = vadd.f32 %v2837_v21, %v188_v62  ;;  %v2012_v62 = vpop.f32.mrb[0].mxu1 }
  0xf3   :  { %269 = vst.msk [vmem:[#allocation2 + $0x8] sm:$0xff] %vm267_vm1, %v194_v63  ;;  %498 = vst.msk [vmem:[#allocation2 + $0x88] sm:$0xff] %vm267_vm1, %v2012_v62  ;;  %v418_v18 = vpop.f32.mrb[1].mxu1  ;;  %v2867_v62 = vpop.xlane.xlu0 %632 }
  0xf4   :  { %268 = vst.msk [vmem:[#allocation2] sm:$0xff] %vm267_vm1, %v189_v9  ;;  %v1983_v56 = vpop.f32.mrb[2].mxu0  ;;  %497 = vst.msk [vmem:[#allocation2 + $0x80] sm:$0xff] %vm267_vm1, %v418_v18  ;;  %v682_v9 = vadd.f32 1.0, %v606_v7  ;;  %v2870_v18 = vpop.eup %2266 }
  0xf5   :  { %v204_v60 = vadd.f32 %v1983_v56, %v2837_v21  ;;  %v198_v51 = vpop.f32.mrb[3].mxu0  ;;  %3887 = vst [vmem:[#allocation36_spill] sm:$0xff] %v2870_v18  ;;  %v2884_v49 = vpop.eup %2268 }
  0xf6   :  { %v199_v5 = vadd.f32 %v2837_v21, %v198_v51  ;;  %v2015_v59 = vpop.f32.mrb[2].mxu1  ;;  %2278 = vrsqrt.f32 %v682_v9  ;;  %3889 = vst [vmem:[#allocation38_spill] sm:$0xff] %v2884_v49 }
  0xf7   :  { %271 = vst.msk [vmem:[#allocation2 + $0x18] sm:$0xff] %vm267_vm1, %v204_v60  ;;  %500 = vst.msk [vmem:[#allocation2 + $0x98] sm:$0xff] %vm267_vm1, %v2015_v59  ;;  %v428_v2 = vpop.f32.mrb[3].mxu1  ;;  %v684_v59 = vadd.f32 1.0, %v2828_v26  ;;  %2280 = vrsqrt.f32 %v681_v36 }
  0xf8   :  { %270 = vst.msk [vmem:[#allocation2 + $0x10] sm:$0xff] %vm267_vm1, %v199_v5  ;;  %v1986_v53 = vpop.f32.mrb[4].mxu0  ;;  %499 = vst.msk [vmem:[#allocation2 + $0x90] sm:$0xff] %vm267_vm1, %v428_v2 }
  0xf9   :  { %v214_v51 = vadd.f32 %v1986_v53, %v2837_v21  ;;  %v208_v12 = vpop.f32.mrb[5].mxu0  ;;  %2282 = vrsqrt.f32 %v684_v59 }
  0xfa   :  { %v209_v63 = vadd.f32 %v2837_v21, %v208_v12  ;;  %v738_v60 = vld [vmem:[#allocation2 + $0x8] sm:$0xff] }
  0xfb   :  { %273 = vst.msk [vmem:[#allocation2 + $0x28] sm:$0xff] %vm267_vm1, %v214_v51  ;;  %v737_v56 = vld [vmem:[#allocation2] sm:$0xff]  ;;  %v2865_v5 = vmul.f32 %v2855_v61, %v738_v60  ;;  %v2876_v51 = vpop.xlane.xlu1 %635  ;;  %v2018_v61 = vpop.f32.mrb[4].mxu1 }
  0xfc   :  { %272 = vst.msk [vmem:[#allocation2 + $0x20] sm:$0xff] %vm267_vm1, %v209_v63  ;;  %v1989_v7 = vpop.f32.mrb[6].mxu0  ;;  %v2874_v53 = vmul.f32 %v2861_v15, %v737_v56  ;;  %v683_v56 = vadd.f32 1.0, %v2826_v32  ;;  %502 = vst.msk [vmem:[#allocation2 + $0xa8] sm:$0xff] %vm267_vm1, %v2018_v61  ;;  %v438_v9 = vpop.f32.mrb[5].mxu1 }
  0xfd   :  { %3886 = vst [vmem:[#allocation35_spill] sm:$0xff] %v2865_v5  ;;  %v224_v16 = vadd.f32 %v1989_v7, %v2837_v21  ;;  %v218_v17 = vpop.f32.mrb[7].mxu0  ;;  %501 = vst.msk [vmem:[#allocation2 + $0xa0] sm:$0xff] %vm267_vm1, %v438_v9  ;;  %v2903_v61 = vpop.xlane.xlu0 %638 }
  0xfe   :  { %3888 = vst [vmem:[#allocation37_spill] sm:$0xff] %v2874_v53  ;;  %v219_v12 = vadd.f32 %v2837_v21, %v218_v17  ;;  %v2115_v60 = vpack.c.bf16 %v2865_v5, %v2874_v53  ;;  %v740_v63 = vld [vmem:[#allocation2 + $0x18] sm:$0xff]  ;;  %v2892_v17 = vpop.eup %2270  ;;  %v2021_v9 = vpop.f32.mrb[6].mxu1  ;;  %2284 = vrsqrt.f32 %v683_v56  ;;  %v687_v56 = vadd.f32 1.0, %v2839_v8 }
  0xff   :  { %275 = vst.msk [vmem:[#allocation2 + $0x38] sm:$0xff] %vm267_vm1, %v224_v16  ;;  %v739_v2 = vld [vmem:[#allocation2 + $0x10] sm:$0xff]  ;;  %v2889_v7 = vmul.f32 %v2870_v18, %v740_v63  ;;  %3891 = vst [vmem:[#allocation40_spill] sm:$0xff] %v2892_v17  ;;  %v2899_v36 = vpop.eup %2272  ;;  %v3893_v63 = vmov 0.0|0.0   ;;  %v448_v59 = vpop.f32.mrb[7].mxu1  ;;  %v689_v8 = vadd.f32 1.0, %v2848_v52 }
 0x100   :  { %274 = vst.msk [vmem:[#allocation2 + $0x30] sm:$0xff] %vm267_vm1, %v219_v12  ;;  %v1992_v26 = vpop.f32.mrb[8].mxu0  ;;  %2116 = vmatpush1.bf16.msra.mxu0 %v2115_v60  ;;  %v2896_v5 = vmul.f32 %v2884_v49, %v739_v2  ;;  %3892 = vst [vmem:[#allocation41_spill] sm:$0xff] %v2899_v36  ;;  %v686_v60 = vadd.f32 1.0, %v2832_v46  ;;  %v2909_v49 = vpop.xlane.xlu1 %641 }
 0x101   :  { %3890 = vst [vmem:[#allocation39_spill] sm:$0xff] %v2889_v7  ;;  %v234_v32 = vadd.f32 %v1992_v26, %v2837_v21  ;;  %v228_v16 = vpop.f32.mrb[9].mxu0  ;;  %2117 = vmatprep.subr.bf16.mxu0 %v3893_v63  ;;  %v685_v26 = vadd.f32 1.0, %v2830_v41  ;;  %504 = vst.msk [vmem:[#allocation2 + $0xb8] sm:$0xff] %vm267_vm1, %v2021_v9  ;;  %v688_v9 = vadd.f32 1.0, %v2841_v6  ;;  %v2939_v6 = vpop.xlane.xlu0 %644 }
 0x102   :  { %v229_v18 = vadd.f32 %v2837_v21, %v228_v16  ;;  %v2118_v12 = vpack.c.bf16 %v2889_v7, %v2896_v5  ;;  %v742_v2 = vld [vmem:[#allocation2 + $0x28] sm:$0xff]  ;;  %v2917_v16 = vpop.eup %2274  ;;  %503 = vst.msk [vmem:[#allocation2 + $0xb0] sm:$0xff] %vm267_vm1, %v448_v59  ;;  %2286 = vrsqrt.f32 %v686_v60 }
 0x103   :  { %277 = vst.msk [vmem:[#allocation2 + $0x48] sm:$0xff] %vm267_vm1, %v234_v32  ;;  %v741_v15 = vld [vmem:[#allocation2 + $0x20] sm:$0xff]  ;;  %v2914_v53 = vmul.f32 %v2892_v17, %v742_v2  ;;  %3894 = vst [vmem:[#allocation42_spill] sm:$0xff] %v2917_v16  ;;  %v2925_v41 = vpop.eup %2276  ;;  %v2024_v17 = vpop.f32.mrb[8].mxu1  ;;  %2288 = vrsqrt.f32 %v685_v26 }
 0x104   :  { %276 = vst.msk [vmem:[#allocation2 + $0x40] sm:$0xff] %vm267_vm1, %v229_v18  ;;  %v1995_v46 = vpop.f32.mrb[10].mxu0  ;;  %2119 = vmatpush1.bf16.msra.mxu0 %v2118_v12  ;;  %v2921_v7 = vmul.f32 %v2899_v36, %v741_v15  ;;  %3895 = vst [vmem:[#allocation43_spill] sm:$0xff] %v2925_v41  ;;  %v690_v36 = vadd.f32 1.0, %v2851_v33  ;;  %v458_v60 = vpop.f32.mrb[9].mxu1  ;;  %2290 = vrsqrt.f32 %v687_v56 }
 0x105   :  { %v244_v32 = vadd.f32 %v1995_v46, %v2837_v21  ;;  %v238_v2 = vpop.f32.mrb[11].mxu0  ;;  %2120 = vmatprep.subr.bf16.mxu0 %v3893_v63  ;;  %506 = vst.msk [vmem:[#allocation2 + $0xc8] sm:$0xff] %vm267_vm1, %v2024_v17  ;;  %505 = vst.msk [vmem:[#allocation2 + $0xc0] sm:$0xff] %vm267_vm1, %v458_v60  ;;  %2292 = vrsqrt.f32 %v688_v9  ;;  %v692_v9 = vadd.f32 1.0, %v2876_v51  ;;  %v651_v51 = vpop.xlane.xlu0 %650 }
 0x106   :  { %v239_v18 = vadd.f32 %v2837_v21, %v238_v2  ;;  %v2121_v15 = vpack.c.bf16 %v2914_v53, %v2921_v7  ;;  %v744_v12 = vld [vmem:[#allocation2 + $0x38] sm:$0xff]  ;;  %v2942_v2 = vpop.eup %2278  ;;  %2294 = vrsqrt.f32 %v689_v8 }
 0x107   :  { %279 = vst.msk [vmem:[#allocation2 + $0x58] sm:$0xff] %vm267_vm1, %v244_v32  ;;  %v743_v59 = vld [vmem:[#allocation2 + $0x30] sm:$0xff]  ;;  %v2936_v46 = vmul.f32 %v2917_v16, %v744_v12  ;;  %3897 = vst [vmem:[#allocation45_spill] sm:$0xff] %v2942_v2  ;;  %v648_v32 = vpop.xlane.xlu1 %647  ;;  %v2949_v12 = vpop.eup %2280  ;;  %2296 = vrsqrt.f32 %v690_v36 }
 0x108   :  { %278 = vst.msk [vmem:[#allocation2 + $0x50] sm:$0xff] %vm267_vm1, %v239_v18  ;;  %v1998_v52 = vpop.f32.mrb[12].mxu0  ;;  %2122 = vmatpush1.bf16.msra.mxu0 %v2121_v15  ;;  %v2946_v26 = vmul.f32 %v2925_v41, %v743_v59  ;;  %3898 = vst [vmem:[#allocation46_spill] sm:$0xff] %v2949_v12  ;;  %v691_v15 = vadd.f32 1.0, %v2867_v62  ;;  %v2027_v59 = vpop.f32.mrb[10].mxu1 }
 0x109   :  { %3896 = vst [vmem:[#allocation44_spill] sm:$0xff] %v2936_v46  ;;  %v254_v33 = vadd.f32 %v1998_v52, %v2837_v21  ;;  %v248_v17 = vpop.f32.mrb[13].mxu0  ;;  %2123 = vmatprep.subr.bf16.mxu0 %v3893_v63  ;;  %508 = vst.msk [vmem:[#allocation2 + $0xd8] sm:$0xff] %vm267_vm1, %v2027_v59  ;;  %v2963_v41 = vpop.eup %2282 }
 0x10a   :  { %v249_v16 = vadd.f32 %v2837_v21, %v248_v17  ;;  %v2124_v18 = vpack.c.bf16 %v2936_v46, %v2946_v26  ;;  %v746_v56 = vld [vmem:[#allocation2 + $0x48] sm:$0xff]  ;;  %v468_v17 = vpop.f32.mrb[11].mxu1  ;;  %3900 = vst [vmem:[#allocation48_spill] sm:$0xff] %v2963_v41  ;;  %v2970_v36 = vpop.eup %2284  ;;  %2298 = vrsqrt.f32 %v691_v15  ;;  %v694_v46 = vadd.f32 1.0, %v2909_v49 }
 0x10b   :  { %281 = vst.msk [vmem:[#allocation2 + $0x68] sm:$0xff] %vm267_vm1, %v254_v33  ;;  %v745_v60 = vld [vmem:[#allocation2 + $0x40] sm:$0xff]  ;;  %v2959_v52 = vmul.f32 %v2942_v2, %v746_v56  ;;  %507 = vst.msk [vmem:[#allocation2 + $0xd0] sm:$0xff] %vm267_vm1, %v468_v17  ;;  %v654_v2 = vpop.xlane.xlu1 %653  ;;  %2300 = vrsqrt.f32 %v692_v9 }
 0x10c   :  { %280 = vst.msk [vmem:[#allocation2 + $0x60] sm:$0xff] %vm267_vm1, %v249_v16  ;;  %v2001_v8 = vpop.f32.mrb[14].mxu0  ;;  %2125 = vmatpush1.bf16.msra.mxu0 %v2124_v18  ;;  %v2967_v62 = vmul.f32 %v2949_v12, %v745_v60  ;;  %3902 = vst [vmem:[#allocation50_spill] sm:$0xff] %v2970_v36  ;;  %v693_v60 = vadd.f32 1.0, %v2903_v61  ;;  %v2030_v12 = vpop.f32.mrb[12].mxu1 }
 0x10d   :  { %3899 = vst [vmem:[#allocation47_spill] sm:$0xff] %v2959_v52  ;;  %v264_v33 = vadd.f32 %v2001_v8, %v2837_v21  ;;  %v258_v56 = vpop.f32.mrb[15].mxu0  ;;  %2126 = vmatprep.subr.bf16.mxu0 %v3893_v63  ;;  %510 = vst.msk [vmem:[#allocation2 + $0xe8] sm:$0xff] %vm267_vm1, %v2030_v12 }
 0x10e   :  { %3901 = vst [vmem:[#allocation49_spill] sm:$0xff] %v2967_v62  ;;  %v259_v59 = vadd.f32 %v2837_v21, %v258_v56  ;;  %v2127_v16 = vpack.c.bf16 %v2959_v52, %v2967_v62  ;;  %v748_v18 = vld [vmem:[#allocation2 + $0x58] sm:$0xff]  ;;  %v478_v21 = vpop.f32.mrb[13].mxu1  ;;  %v2984_v56 = vpop.eup %2286  ;;  %2302 = vrsqrt.f32 %v693_v60 }
 0x10f   :  { %283 = vst.msk [vmem:[#allocation2 + $0x78] sm:$0xff] %vm267_vm1, %v264_v33  ;;  %v747_v17 = vld [vmem:[#allocation2 + $0x50] sm:$0xff]  ;;  %v2980_v8 = vmul.f32 %v2963_v41, %v748_v18  ;;  %3904 = vst [vmem:[#allocation52_spill] sm:$0xff] %v2984_v56  ;;  %v2991_v15 = vpop.eup %2288  ;;  %v695_v33 = vadd.f32 1.0, %v2939_v6  ;;  %2304 = vrsqrt.f32 %v694_v46  ;;  %v657_v41 = vpop.xlane.xlu0 %656  ;;  %v753_v46 = vld [vmem:[#allocation2 + $0x80] sm:$0xff] }
 0x110   :  { %282 = vst.msk [vmem:[#allocation2 + $0x70] sm:$0xff] %vm267_vm1, %v259_v59  ;;  %2128 = vmatpush1.bf16.msra.mxu0 %v2127_v16  ;;  %v2988_v61 = vmul.f32 %v2970_v36, %v747_v17  ;;  %509 = vst.msk [vmem:[#allocation2 + $0xe0] sm:$0xff] %vm267_vm1, %v478_v21  ;;  %v2994_v9 = vpop.eup %2290  ;;  %v2033_v59 = vpop.f32.mrb[14].mxu1  ;;  %v696_v21 = vadd.f32 1.0, %v648_v32 }
 0x111   :  { %3903 = vst [vmem:[#allocation51_spill] sm:$0xff] %v2980_v8  ;;  %3906 = vst [vmem:[#allocation54_spill] sm:$0xff] %v2991_v15  ;;  %2129 = vmatprep.subr.bf16.mxu0 %v3893_v63  ;;  %v2999_v16 = vpop.eup %2292  ;;  %v488_v36 = vpop.f32.mrb[15].mxu1  ;;  %2306 = vrsqrt.f32 %v695_v33 }
 0x112   :  { %3905 = vst [vmem:[#allocation53_spill] sm:$0xff] %v2988_v61  ;;  %3907 = vst [vmem:[#allocation55_spill] sm:$0xff] %v2994_v9  ;;  %v2130_v49 = vpack.c.bf16 %v2980_v8, %v2988_v61  ;;  %v750_v12 = vld [vmem:[#allocation2 + $0x68] sm:$0xff]  ;;  %v3005_v52 = vpop.eup %2294  ;;  %v660_v6 = vpop.xlane.xlu1 %659  ;;  %2308 = vrsqrt.f32 %v696_v21  ;;  %v756_v21 = vld [vmem:[#allocation2 + $0x98] sm:$0xff] }
 0x113   :  { %3908 = vst [vmem:[#allocation56_spill] sm:$0xff] %v2999_v16  ;;  %v749_v18 = vld [vmem:[#allocation2 + $0x60] sm:$0xff]  ;;  %v3002_v17 = vmul.f32 %v2984_v56, %v750_v12  ;;  %512 = vst.msk [vmem:[#allocation2 + $0xf8] sm:$0xff] %vm267_vm1, %v2033_v59  ;;  %v3011_v8 = vpop.eup %2296  ;;  %v754_v12 = vld [vmem:[#allocation2 + $0x88] sm:$0xff]  ;;  %v697_v56 = vadd.f32 1.0, %v651_v51  ;;  %v3025_v62 = vmul.f32 %v3005_v52, %v753_v46 }
 0x114   :  { %3910 = vst [vmem:[#allocation58_spill] sm:$0xff] %v3005_v52  ;;  %2131 = vmatpush1.bf16.msra.mxu0 %v2130_v49  ;;  %v3008_v60 = vmul.f32 %v2991_v15, %v749_v18  ;;  %511 = vst.msk [vmem:[#allocation2 + $0xf0] sm:$0xff] %vm267_vm1, %v488_v36  ;;  %v698_v15 = vadd.f32 1.0, %v654_v2  ;;  %v3019_v61 = vpop.eup %2298  ;;  %v755_v51 = vld [vmem:[#allocation2 + $0x90] sm:$0xff] }
 0x115   :  { %3909 = vst [vmem:[#allocation57_spill] sm:$0xff] %v3002_v17  ;;  %3911 = vst [vmem:[#allocation59_spill] sm:$0xff] %v3011_v8  ;;  %2132 = vmatprep.subr.bf16.mxu0 %v3893_v63  ;;  %v3030_v33 = vpop.eup %2300  ;;  %2310 = vrsqrt.f32 %v697_v56  ;;  %v758_v56 = vld [vmem:[#allocation2 + $0xa8] sm:$0xff] }
 0x116   :  { %v2133_v32 = vpack.c.bf16 %v3002_v17, %v3008_v60  ;;  %v752_v59 = vld [vmem:[#allocation2 + $0x78] sm:$0xff]  ;;  %3913 = vst [vmem:[#allocation61_spill] sm:$0xff] %v3019_v61  ;;  %v3028_v17 = vmul.f32 %v3011_v8, %v754_v12  ;;  %3915 = vst [vmem:[#allocation63_spill] sm:$0xff] %v3030_v33  ;;  %2312 = vrsqrt.f32 %v698_v15  ;;  %v3040_v8 = vmul.f32 %v3019_v61, %v755_v51 }
 0x117   :  { %v751_v49 = vld [vmem:[#allocation2 + $0x70] sm:$0xff]  ;;  %v3017_v18 = vmul.f32 %v2999_v16, %v752_v59  ;;  %v663_v59 = vpop.xlane.xlu0 %662  ;;  %v700_v16 = vadd.f32 1.0, %v660_v6  ;;  %v3043_v52 = vmul.f32 %v3030_v33, %v756_v21 }
 0x118   :  { %2134 = vmatpush1.bf16.msra.mxu0 %v2133_v32  ;;  %v3022_v36 = vmul.f32 %v2994_v9, %v751_v49  ;;  %3914 = vst [vmem:[#allocation62_spill] sm:$0xff] %v3028_v17  ;;  %v699_v32 = vadd.f32 1.0, %v657_v41  ;;  %v666_v49 = vpop.xlane.xlu1 %665  ;;  %v3035_v46 = vpop.eup %2302  ;;  %v2139_v12 = vpack.c.bf16 %v3028_v17, %v3025_v62  ;;  %v757_v41 = vld [vmem:[#allocation2 + $0xa0] sm:$0xff]  ;;  %v701_v15 = vadd.f32 1.0, %v663_v59  ;;  %v760_v59 = vld [vmem:[#allocation2 + $0xb8] sm:$0xff] }
 0x119   :  { %3912 = vst [vmem:[#allocation60_spill] sm:$0xff] %v3017_v18  ;;  %2135 = vmatprep.subr.bf16.mxu0 %v3893_v63  ;;  %3916 = vst [vmem:[#allocation64_spill] sm:$0xff] %v3035_v46  ;;  %v3045_v9 = vpop.eup %2304  ;;  %v702_v6 = vadd.f32 1.0, %v666_v49  ;;  %v2142_v51 = vpack.c.bf16 %v3043_v52, %v3040_v8  ;;  %v3053_v21 = vmul.f32 %v3035_v46, %v757_v41 }
 0x11a   :  { %v2136_v2 = vpack.c.bf16 %v3017_v18, %v3022_v36  ;;  %3917 = vst [vmem:[#allocation65_spill] sm:$0xff] %v3045_v9  ;;  %2314 = vrsqrt.f32 %v699_v32  ;;  %v3056_v33 = vmul.f32 %v3045_v9, %v758_v56 }
 0x11b   :  { %2316 = vrsqrt.f32 %v700_v16  ;;  %v3048_v18 = vpop.eup %2306  ;;  %v759_v16 = vld [vmem:[#allocation2 + $0xb0] sm:$0xff] }
 0x11c   :  { %2137 = vmatpush1.bf16.msra.mxu0 %v2136_v2  ;;  %v669_v2 = vpop.xlane.xlu0 %668  ;;  %3918 = vst [vmem:[#allocation66_spill] sm:$0xff] %v3048_v18  ;;  %v672_v61 = vpop.xlane.xlu1 %671  ;;  %2318 = vrsqrt.f32 %v701_v15  ;;  %v2145_v41 = vpack.c.bf16 %v3056_v33, %v3053_v21  ;;  %v3066_v56 = vmul.f32 %v3048_v18, %v759_v16  ;;  %v761_v15 = vld [vmem:[#allocation2 + $0xc0] sm:$0xff]  ;;  %v764_v18 = vld [vmem:[#allocation2 + $0xd8] sm:$0xff] }
 0x11d   :  { %2138 = vmatprep.subr.bf16.mxu0 %v3893_v63  ;;  %v3058_v17 = vpop.eup %2308  ;;  %v703_v32 = vadd.f32 1.0, %v669_v2  ;;  %2320 = vrsqrt.f32 %v702_v6  ;;  %v704_v49 = vadd.f32 1.0, %v672_v61  ;;  %v762_v2 = vld [vmem:[#allocation2 + $0xc8] sm:$0xff] }
 0x11e   :  { %3919 = vst [vmem:[#allocation67_spill] sm:$0xff] %v3058_v17  ;;  %v3069_v9 = vmul.f32 %v3058_v17, %v760_v59  ;;  %v763_v17 = vld [vmem:[#allocation2 + $0xd0] sm:$0xff] }
 0x11f   :  { %2322 = vrsqrt.f32 %v703_v32 }
 0x120   :  { %2140 = vmatpush1.bf16.msra.mxu0 %v2139_v12  ;;  %v3061_v12 = vpop.eup %2310  ;;  %3921 = vst [vmem:[#allocation69_spill] sm:$0xff] %v3069_v9  ;;  %2324 = vrsqrt.f32 %v704_v49  ;;  %v2148_v6 = vpack.c.bf16 %v3069_v9, %v3066_v56 }
 0x121   :  { %2141 = vmatprep.subr.bf16.mxu0 %v3893_v63  ;;  %3920 = vst [vmem:[#allocation68_spill] sm:$0xff] %v3061_v12  ;;  %v3071_v46 = vpop.eup %2312 }
 0x122   :  { %3922 = vst [vmem:[#allocation70_spill] sm:$0xff] %v3071_v46  ;;  %v3082_v16 = vmul.f32 %v3071_v46, %v762_v2  ;;  %v765_v46 = vld [vmem:[#allocation2 + $0xe0] sm:$0xff] }
 0x124   :  { %2143 = vmatpush1.bf16.msra.mxu0 %v2142_v51  ;;  %v3074_v61 = vpop.eup %2314  ;;  %v3079_v51 = vmul.f32 %v3061_v12, %v761_v15  ;;  %3925 = vst [vmem:[#allocation73_spill] sm:$0xff] %v3082_v16  ;;  %v766_v12 = vld [vmem:[#allocation2 + $0xe8] sm:$0xff] }
 0x125   :  { %2144 = vmatprep.subr.bf16.mxu0 %v3893_v63  ;;  %3923 = vst [vmem:[#allocation71_spill] sm:$0xff] %v3074_v61  ;;  %v3084_v59 = vpop.eup %2316 }
 0x126   :  { %3924 = vst [vmem:[#allocation72_spill] sm:$0xff] %v3079_v51  ;;  %3926 = vst [vmem:[#allocation74_spill] sm:$0xff] %v3084_v59  ;;  %v3087_v32 = vpop.eup %2318  ;;  %v2151_v49 = vpack.c.bf16 %v3082_v16, %v3079_v51  ;;  %v3095_v15 = vmul.f32 %v3084_v59, %v764_v18  ;;  %v767_v59 = vld [vmem:[#allocation2 + $0xf0] sm:$0xff] }
 0x127   :  { %3927 = vst [vmem:[#allocation75_spill] sm:$0xff] %v3087_v32  ;;  %v3097_v2 = vpop.eup %2320  ;;  %v3105_v16 = vmul.f32 %v3087_v32, %v765_v46 }
 0x128   :  { %2146 = vmatpush1.bf16.msra.mxu0 %v2145_v41  ;;  %v3092_v41 = vmul.f32 %v3074_v61, %v763_v17  ;;  %3928 = vst [vmem:[#allocation76_spill] sm:$0xff] %v3095_v15  ;;  %3929 = vst [vmem:[#allocation77_spill] sm:$0xff] %v3097_v2  ;;  %v3108_v17 = vmul.f32 %v3097_v2, %v766_v12  ;;  %v768_v61 = vld [vmem:[#allocation2 + $0xf8] sm:$0xff]  ;;  %v1129_v12 = vld [vmem:[%s3741_s7] sm:$0xff] }
 0x129   :  { %2147 = vmatprep.subr.bf16.mxu0 %v3893_v63  ;;  %v3100_v9 = vpop.eup %2322 }
 0x12a   :  { %3930 = vst [vmem:[#allocation78_spill] sm:$0xff] %v3100_v9  ;;  %v3110_v18 = vpop.eup %2324  ;;  %v2157_v51 = vpack.c.bf16 %v3108_v17, %v3105_v16 }
 0x12b   :  { %3931 = vst [vmem:[#allocation79_spill] sm:$0xff] %v3110_v18 }
 0x12c   :  { %2149 = vmatpush1.bf16.msra.mxu0 %v2148_v6  ;;  %v2154_v6 = vpack.c.bf16 %v3095_v15, %v3092_v41  ;;  %v3119_v15 = vmul.f32 %v3110_v18, %v768_v61  ;;  %v2326_v61 = vld [vmem:[#allocation3 + $0x8] sm:$0xff] }
 0x12d   :  { %2150 = vmatprep.subr.bf16.mxu0 %v3893_v63 }
 0x130   :  { %2152 = vmatpush1.bf16.msra.mxu0 %v2151_v49  ;;  %v3116_v49 = vmul.f32 %v3100_v9, %v767_v59  ;;  %v1130_v59 = vld [vmem:[%s3741_s7 + $0x8] sm:$0xff] }
 0x131   :  { %2153 = vmatprep.subr.bf16.mxu0 %v3893_v63 }
 0x132   :  { %v2160_v46 = vpack.c.bf16 %v3119_v15, %v3116_v49 }
 0x134   :  { %2155 = vmatpush1.bf16.msra.mxu0 %v2154_v6  ;;  %v2162_v6 = vpack.c.bf16 %v1130_v59, %v1129_v12 }
 0x135   :  { %2156 = vmatprep.subr.bf16.mxu0 %v3893_v63 }
 0x136   :  { %2163 = vmatprep.subr.bf16.mxu1 %v2162_v6 }
 0x137   :  { %2165 = vmatpush3.bf16.msra.mxu1 %v2162_v6  ;;  %v3218_v6 = vld [vmem:[%s3740_s6] ss:$0 sm:$0xff] }
 0x138   :  { %2158 = vmatpush1.bf16.msra.mxu0 %v2157_v51 }
 0x139   :  { %2159 = vmatprep.subr.bf16.mxu0 %v3893_v63 }
 0x13c   :  { %2161 = vmatpush1.bf16.msra.mxu0 %v2160_v46  ;;  %v3959_v46 = vld [vmem:[#allocation37_spill] sm:$0xff] }
 0x13d   :  { %2178 = vmatprep.subr.bf16.mxu0 %v3893_v63 }
 0x13f   :  { %866 = vmatmul.mubr.f32.vlgmr.msra.gmra.mrb[16].mxu0 %v2532_v20  ;;  %v3932_v20 = vld [vmem:[#allocation6_spill] sm:$0xff] }
 0x140   :  { %870 = vmatprep.mubr.f32.mxu0 %v2547_v27  ;;  %v3936_v27 = vld [vmem:[#allocation9_spill] sm:$0xff] }
 0x143   :  { %871 = vmatmul.mubr.f32.gmra.mrb[18].mxu0 %v2542_v25  ;;  %v3935_v25 = vld [vmem:[#allocation10_spill] sm:$0xff] }
 0x144   :  { %875 = vmatprep.mubr.f32.mxu0 %v2540_v24  ;;  %v3934_v24 = vld [vmem:[#allocation7_spill] sm:$0xff] }
 0x147   :  { %876 = vmatmul.mubr.f32.gmra.mrb[20].mxu0 %v2538_v23  ;;  %v3933_v23 = vld [vmem:[#allocation8_spill] sm:$0xff] }
 0x148   :  { %880 = vmatprep.mubr.f32.mxu0 %v2551_v29  ;;  %v1131_v29 = vld [vmem:[%s3741_s7 + $0x10] sm:$0xff] }
 0x14b   :  { %881 = vmatmul.mubr.f32.gmra.mrb[22].mxu0 %v2549_v28  ;;  %v3937_v28 = vld [vmem:[#allocation12_spill] sm:$0xff] }
 0x14c   :  { %885 = vmatprep.mubr.f32.mxu0 %v2567_v35 }
 0x14f   :  { %886 = vmatmul.mubr.f32.gmra.mrb[24].mxu0 %v2565_v34  ;;  %v1132_v34 = vld [vmem:[%s3741_s7 + $0x18] sm:$0xff] }
 0x150   :  { %890 = vmatprep.mubr.f32.mxu0 %v2575_v38  ;;  %v2166_v35 = vpack.c.bf16 %v1132_v34, %v1131_v29  ;;  %v3939_v38 = vld [vmem:[#allocation14_spill] sm:$0xff] }
 0x152   :  { %2167 = vmatprep.subr.bf16.mxu1 %v2166_v35 }
 0x153   :  { %891 = vmatmul.mubr.f32.gmra.mrb[26].mxu0 %v2573_v37  ;;  %v3938_v37 = vld [vmem:[#allocation11_spill] sm:$0xff]  ;;  %2169 = vmatpush3.bf16.msra.mxu1 %v2166_v35  ;;  %v3962_v35 = vld [vmem:[#allocation33_spill] sm:$0xff] }
 0x154   :  { %895 = vmatprep.mubr.f32.mxu0 %v2595_v45  ;;  %v1134_v45 = vld [vmem:[%s3741_s7 + $0x28] sm:$0xff] }
 0x157   :  { %896 = vmatmul.mubr.f32.gmra.mrb[28].mxu0 %v2593_v44  ;;  %v1133_v44 = vld [vmem:[%s3741_s7 + $0x20] sm:$0xff] }
 0x158   :  { %900 = vmatprep.mubr.f32.mxu0 %v2603_v48  ;;  %v3940_v48 = vld [vmem:[#allocation13_spill] sm:$0xff] }
 0x15b   :  { %901 = vmatmul.mubr.f32.gmra.mrb[30].mxu0 %v2601_v47  ;;  %v2170_v47 = vpack.c.bf16 %v1134_v45, %v1133_v44 }
 0x15c   :  { %905 = vmatprep.mubr.f32.mxu0 %v2623_v55  ;;  %v1135_v55 = vld [vmem:[%s3741_s7 + $0x30] sm:$0xff] }
 0x15d   :  { %2171 = vmatprep.subr.bf16.mxu1 %v2170_v47 }
 0x15e   :  { %2173 = vmatpush3.bf16.msra.mxu1 %v2170_v47 }
 0x15f   :  { %906 = vmatmul.mubr.f32.gmra.mrb[32].mxu0 %v2621_v54  ;;  %v3941_v54 = vld [vmem:[#allocation16_spill] sm:$0xff] }
 0x160   :  { %910 = vmatprep.mubr.f32.mxu0 %v2631_v58 }
 0x163   :  { %911 = vmatmul.mubr.f32.gmra.mrb[34].mxu0 %v2629_v57  ;;  %v1136_v57 = vld [vmem:[%s3741_s7 + $0x38] sm:$0xff] }
 0x164   :  { %915 = vmatprep.mubr.f32.mxu0 %v2651_v1  ;;  %v2174_v58 = vpack.c.bf16 %v1136_v57, %v1135_v55  ;;  %v3943_v1 = vld [vmem:[#allocation18_spill] sm:$0xff] }
 0x166   :  { %2175 = vmatprep.subr.bf16.mxu1 %v2174_v58 }
 0x167   :  { %916 = vmatmul.mubr.f32.gmra.mrb[36].mxu0 %v2649_v0  ;;  %v3942_v0 = vld [vmem:[#allocation15_spill] sm:$0xff]  ;;  %2177 = vmatpush3.bf16.msra.mxu1 %v2174_v58 }
 0x168   :  { %920 = vmatprep.mubr.f32.mxu0 %v2659_v4  ;;  %2226 = vmatprep.subr.bf16.mxu1 %v3893_v63  ;;  %v3945_v4 = vld [vmem:[#allocation20_spill] sm:$0xff] }
 0x16b   :  { %921 = vmatmul.mubr.f32.gmra.mrb[38].mxu0 %v2657_v3  ;;  %v3944_v3 = vld [vmem:[#allocation17_spill] sm:$0xff] }
 0x16c   :  { %925 = vmatprep.mubr.f32.mxu0 %v2679_v11  ;;  %v3947_v11 = vld [vmem:[#allocation22_spill] sm:$0xff] }
 0x16f   :  { %926 = vmatmul.mubr.f32.gmra.mrb[40].mxu0 %v2677_v10  ;;  %v3946_v10 = vld [vmem:[#allocation19_spill] sm:$0xff] }
 0x170   :  { %930 = vmatprep.mubr.f32.mxu0 %v2687_v14  ;;  %v3949_v14 = vld [vmem:[#allocation24_spill] sm:$0xff] }
 0x173   :  { %931 = vmatmul.mubr.f32.gmra.mrb[42].mxu0 %v2685_v13  ;;  %v3948_v13 = vld [vmem:[#allocation21_spill] sm:$0xff] }
 0x174   :  { %935 = vmatprep.mubr.f32.mxu0 %v2704_v22  ;;  %v3951_v22 = vld [vmem:[#allocation26_spill] sm:$0xff] }
 0x177   :  { %936 = vmatmul.mubr.f32.gmra.mrb[44].mxu0 %v2702_v19  ;;  %v3950_v19 = vld [vmem:[#allocation23_spill] sm:$0xff] }
 0x178   :  { %940 = vmatprep.mubr.f32.mxu0 %v2712_v31  ;;  %v3953_v31 = vld [vmem:[#allocation28_spill] sm:$0xff] }
 0x17b   :  { %941 = vmatmul.mubr.f32.gmra.mrb[46].mxu0 %v2710_v30  ;;  %v3952_v30 = vld [vmem:[#allocation25_spill] sm:$0xff] }
 0x17c   :  { %945 = vmatprep.mubr.f32.mxu0 %v2726_v40  ;;  %v3955_v40 = vld [vmem:[#allocation30_spill] sm:$0xff] }
 0x17f   :  { %946 = vmatmul.mubr.f32.gmra.mrb[48].mxu0 %v2724_v39  ;;  %v3954_v39 = vld [vmem:[#allocation27_spill] sm:$0xff] }
 0x180   :  { %950 = vmatprep.mubr.f32.mxu0 %v2734_v43  ;;  %v3957_v43 = vld [vmem:[#allocation32_spill] sm:$0xff] }
 0x183   :  { %951 = vmatmul.mubr.f32.gmra.mrb[50].mxu0 %v2732_v42  ;;  %v3956_v42 = vld [vmem:[#allocation29_spill] sm:$0xff] }
 0x184   :  { %955 = vmatprep.mubr.f32.mxu0 %v2743_v50  ;;  %v3958_v50 = vld [vmem:[#allocation31_spill] sm:$0xff] }
 0x187   :  { %956 = vmatmul.mubr.f32.gmra.mrb[52].mxu0 %v3932_v20  ;;  %v3960_v20 = vld [vmem:[#allocation34_spill] sm:$0xff] }
 0x188   :  { %960 = vmatprep.mubr.f32.mxu0 %v3933_v23 }
 0x18b   :  { %961 = vmatmul.mubr.f32.gmra.mrb[54].mxu0 %v3934_v24 }
 0x18c   :  { %965 = vmatprep.mubr.f32.mxu0 %v3935_v25 }
 0x18f   :  { %966 = vmatmul.mubr.f32.gmra.mrb[56].mxu0 %v3936_v27  ;;  %v3961_v27 = vld [vmem:[#allocation35_spill] sm:$0xff] }
 0x190   :  { %970 = vmatprep.mubr.f32.mxu0 %v3937_v28 }
 0x193   :  { %971 = vmatmul.mubr.f32.gmra.mrb[58].mxu0 %v3938_v37 }
 0x194   :  { %975 = vmatprep.mubr.f32.mxu0 %v3939_v38 }
 0x197   :  { %976 = vmatmul.mubr.f32.gmra.mrb[60].mxu0 %v3940_v48 }
 0x198   :  { %980 = vmatprep.mubr.f32.mxu0 %v3941_v54  ;;  %v3963_v54 = vld [vmem:[#allocation38_spill] sm:$0xff] }
 0x19b   :  { %981 = vmatmul.mubr.f32.gmra.mrb[62].mxu0 %v3942_v0  ;;  %v3964_v0 = vld [vmem:[#allocation39_spill] sm:$0xff] }
 0x19c   :  { %985 = vmatprep.mubr.f32.mxu0 %v3943_v1 }
 0x19f   :  { %986 = vmatmul.mubr.f32.gmra.mrb[64].mxu0 %v3944_v3 }
 0x1a0   :  { %990 = vmatprep.mubr.f32.mxu0 %v3945_v4 }
 0x1a3   :  { %991 = vmatmul.mubr.f32.gmra.mrb[66].mxu0 %v3946_v10  ;;  %v3965_v10 = vld [vmem:[#allocation36_spill] sm:$0xff] }
 0x1a4   :  { %995 = vmatprep.mubr.f32.mxu0 %v3947_v11 }
 0x1a7   :  { %996 = vmatmul.mubr.f32.gmra.mrb[68].mxu0 %v3948_v13 }
 0x1a8   :  { %1000 = vmatprep.mubr.f32.mxu0 %v3949_v14 }
 0x1ab   :  { %1001 = vmatmul.mubr.f32.gmra.mrb[70].mxu0 %v3950_v19 }
 0x1ac   :  { %1005 = vmatprep.mubr.f32.mxu0 %v3951_v22 }
 0x1af   :  { %1006 = vmatmul.mubr.f32.gmra.mrb[72].mxu0 %v3952_v30  ;;  %v3966_v30 = vld [vmem:[#allocation41_spill] sm:$0xff] }
 0x1b0   :  { %1010 = vmatprep.mubr.f32.mxu0 %v3953_v31 }
 0x1b3   :  { %1011 = vmatmul.mubr.f32.gmra.mrb[74].mxu0 %v3954_v39 }
 0x1b4   :  { %1015 = vmatprep.mubr.f32.mxu0 %v3955_v40 }
 0x1b7   :  { %1016 = vmatmul.mubr.f32.gmra.mrb[76].mxu0 %v3956_v42 }
 0x1b8   :  { %1020 = vmatprep.mubr.f32.mxu0 %v3957_v43 }
 0x1bb   :  { %1021 = vmatmul.mubr.f32.gmra.mrb[78].mxu0 %v3958_v50 }
 0x1bc   :  { %1554 = vmatprep.mubr.f32.mxu0 %v2326_v61  ;;  %v3967_v61 = vld [vmem:[#allocation40_spill] sm:$0xff] }
 0x212   :  { %v867_v51 = vpop.f32.mrb[16].mxu0 }
 0x213   :  { %v868_v12 = vadd.f32 %v867_v51, %v3959_v46  ;;  %v869_v59 = vpop.f32.mrb[17].mxu0 }
 0x215   :  { %v1026_v23 = vmul.f32 %v3960_v20, %v868_v12 }
 0x216   :  { %v872_v24 = vpop.f32.mrb[18].mxu0 }
 0x217   :  { %v1065_v25 = vadd.f32 %v3218_v6, %v1026_v23  ;;  %v873_v28 = vadd.f32 %v872_v24, %v3961_v27  ;;  %v874_v29 = vpop.f32.mrb[19].mxu0  ;;  %v3968_v24 = vld [vmem:[#allocation43_spill] sm:$0xff] }
 0x219   :  { %v1097_v34 = vmax.f32 %v1065_v25, 0.0  ;;  %v1027_v37 = vmul.f32 %v3962_v35, %v873_v28  ;;  %v3969_v28 = vld [vmem:[#allocation44_spill] sm:$0xff] }
 0x21a   :  { %v877_v38 = vpop.f32.mrb[20].mxu0 }
 0x21b   :  { %v1066_v44 = vadd.f32 %v3218_v6, %v1027_v37  ;;  %v878_v45 = vadd.f32 %v877_v38, %v2896_v5  ;;  %v879_v47 = vpop.f32.mrb[21].mxu0  ;;  %2050 = vmatprep.mubr.msk.f32.mxu1 %vm267_vm1, %v1097_v34  ;;  %v3970_v38 = vld [vmem:[#allocation42_spill] sm:$0xff] }
 0x21c   :  { %v3971_v47 = vld [vmem:[#allocation49_spill] sm:$0xff] }
 0x21d   :  { %v1098_v48 = vmax.f32 %v1066_v44, 0.0  ;;  %v1028_v55 = vmul.f32 %v3963_v54, %v878_v45 }
 0x21e   :  { %v882_v57 = vpop.f32.mrb[22].mxu0 }
 0x21f   :  { %v1067_v58 = vadd.f32 %v3218_v6, %v1028_v55  ;;  %v883_v1 = vadd.f32 %v882_v57, %v3964_v0  ;;  %v884_v3 = vpop.f32.mrb[23].mxu0  ;;  %2051 = vmatmul.mubr.msk.f32.vlgmr.msra.gmra.mrb[16].mxu1 %vm267_vm1, %v1098_v48 }
 0x221   :  { %v1099_v4 = vmax.f32 %v1067_v58, 0.0  ;;  %v1029_v11 = vmul.f32 %v3965_v10, %v883_v1  ;;  %v3972_v58 = vld [vmem:[#allocation46_spill] sm:$0xff] }
 0x222   :  { %v887_v13 = vpop.f32.mrb[24].mxu0 }
 0x223   :  { %v1068_v5 = vadd.f32 %v3218_v6, %v1029_v11  ;;  %v888_v14 = vadd.f32 %v887_v13, %v2921_v7  ;;  %v889_v19 = vpop.f32.mrb[25].mxu0  ;;  %2053 = vmatprep.mubr.msk.f32.mxu1 %vm267_vm1, %v1099_v4  ;;  %v3973_v4 = vld [vmem:[#allocation47_spill] sm:$0xff] }
 0x225   :  { %v1100_v22 = vmax.f32 %v1068_v5, 0.0  ;;  %v1030_v31 = vmul.f32 %v3966_v30, %v888_v14  ;;  %v3974_v14 = vld [vmem:[#allocation45_spill] sm:$0xff] }
 0x226   :  { %v892_v39 = vpop.f32.mrb[26].mxu0 }
 0x227   :  { %v1069_v40 = vadd.f32 %v3218_v6, %v1030_v31  ;;  %v893_v42 = vadd.f32 %v892_v39, %v2914_v53  ;;  %v894_v43 = vpop.f32.mrb[27].mxu0  ;;  %2054 = vmatmul.mubr.msk.f32.gmra.mrb[18].mxu1 %vm267_vm1, %v1100_v22  ;;  %v3975_v39 = vld [vmem:[#allocation53_spill] sm:$0xff] }
 0x229   :  { %v1101_v50 = vmax.f32 %v1069_v40, 0.0  ;;  %v1031_v51 = vmul.f32 %v3967_v61, %v893_v42 }
 0x22a   :  { %v897_v46 = vpop.f32.mrb[28].mxu0 }
 0x22b   :  { %v1070_v7 = vadd.f32 %v3218_v6, %v1031_v51  ;;  %v898_v12 = vadd.f32 %v897_v46, %v2946_v26  ;;  %v899_v59 = vpop.f32.mrb[29].mxu0  ;;  %2056 = vmatprep.mubr.msk.f32.mxu1 %vm267_vm1, %v1101_v50  ;;  %v3976_v50 = vld [vmem:[#allocation50_spill] sm:$0xff] }
 0x22d   :  { %v1102_v23 = vmax.f32 %v1070_v7, 0.0  ;;  %v1032_v25 = vmul.f32 %v3968_v24, %v898_v12  ;;  %v3977_v12 = vld [vmem:[#allocation51_spill] sm:$0xff] }
 0x22e   :  { %v902_v27 = vpop.f32.mrb[30].mxu0 }
 0x22f   :  { %v1071_v53 = vadd.f32 %v3218_v6, %v1032_v25  ;;  %v903_v29 = vadd.f32 %v902_v27, %v3969_v28  ;;  %v904_v34 = vpop.f32.mrb[31].mxu0  ;;  %2057 = vmatmul.mubr.msk.f32.gmra.mrb[20].mxu1 %vm267_vm1, %v1102_v23  ;;  %v3978_v27 = vld [vmem:[#allocation48_spill] sm:$0xff] }
 0x231   :  { %v1103_v37 = vmax.f32 %v1071_v53, 0.0  ;;  %v1033_v44 = vmul.f32 %v3970_v38, %v903_v29 }
 0x232   :  { %v907_v45 = vpop.f32.mrb[32].mxu0 }
 0x233   :  { %v1072_v26 = vadd.f32 %v3218_v6, %v1033_v44  ;;  %v908_v48 = vadd.f32 %v907_v45, %v3971_v47  ;;  %v909_v55 = vpop.f32.mrb[33].mxu0  ;;  %2059 = vmatprep.mubr.msk.f32.mxu1 %vm267_vm1, %v1103_v37  ;;  %v3979_v45 = vld [vmem:[#allocation54_spill] sm:$0xff] }
 0x234   :  { %v3980_v55 = vld [vmem:[#allocation57_spill] sm:$0xff] }
 0x235   :  { %v1104_v57 = vmax.f32 %v1072_v26, 0.0  ;;  %v1034_v0 = vmul.f32 %v3972_v58, %v908_v48 }
 0x236   :  { %v912_v1 = vpop.f32.mrb[34].mxu0 }
 0x237   :  { %v1073_v3 = vadd.f32 %v3218_v6, %v1034_v0  ;;  %v913_v11 = vadd.f32 %v912_v1, %v3973_v4  ;;  %v914_v13 = vpop.f32.mrb[35].mxu0  ;;  %2060 = vmatmul.mubr.msk.f32.gmra.mrb[22].mxu1 %vm267_vm1, %v1104_v57 }
 0x239   :  { %v1105_v5 = vmax.f32 %v1073_v3, 0.0  ;;  %v1035_v19 = vmul.f32 %v3974_v14, %v913_v11  ;;  %v3981_v3 = vld [vmem:[#allocation52_spill] sm:$0xff] }
 0x23a   :  { %v917_v22 = vpop.f32.mrb[36].mxu0 }
 0x23b   :  { %v1074_v31 = vadd.f32 %v3218_v6, %v1035_v19  ;;  %v918_v40 = vadd.f32 %v917_v22, %v3975_v39  ;;  %v919_v42 = vpop.f32.mrb[37].mxu0  ;;  %2062 = vmatprep.mubr.msk.f32.mxu1 %vm267_vm1, %v1105_v5  ;;  %v3982_v22 = vld [vmem:[#allocation55_spill] sm:$0xff] }
 0x23c   :  { %v3983_v42 = vld [vmem:[#allocation60_spill] sm:$0xff] }
 0x23d   :  { %v1106_v43 = vmax.f32 %v1074_v31, 0.0  ;;  %v1036_v51 = vmul.f32 %v3976_v50, %v918_v40 }
 0x23e   :  { %v922_v46 = vpop.f32.mrb[38].mxu0 }
 0x23f   :  { %v1075_v7 = vadd.f32 %v3218_v6, %v1036_v51  ;;  %v923_v59 = vadd.f32 %v922_v46, %v3977_v12  ;;  %v924_v23 = vpop.f32.mrb[39].mxu0  ;;  %2063 = vmatmul.mubr.msk.f32.gmra.mrb[24].mxu1 %vm267_vm1, %v1106_v43 }
 0x241   :  { %v1107_v25 = vmax.f32 %v1075_v7, 0.0  ;;  %v1037_v53 = vmul.f32 %v3978_v27, %v923_v59  ;;  %v3984_v7 = vld [vmem:[#allocation56_spill] sm:$0xff] }
 0x242   :  { %v927_v28 = vpop.f32.mrb[40].mxu0 }
 0x243   :  { %v1076_v29 = vadd.f32 %v3218_v6, %v1037_v53  ;;  %v928_v34 = vadd.f32 %v927_v28, %v3008_v60  ;;  %v929_v37 = vpop.f32.mrb[41].mxu0  ;;  %2065 = vmatprep.mubr.msk.f32.mxu1 %vm267_vm1, %v1107_v25  ;;  %v3985_v28 = vld [vmem:[#allocation58_spill] sm:$0xff] }
 0x245   :  { %v1108_v44 = vmax.f32 %v1076_v29, 0.0  ;;  %v1038_v26 = vmul.f32 %v3979_v45, %v928_v34 }
 0x246   :  { %v932_v47 = vpop.f32.mrb[42].mxu0 }
 0x247   :  { %v1077_v48 = vadd.f32 %v3218_v6, %v1038_v26  ;;  %v933_v57 = vadd.f32 %v932_v47, %v3980_v55  ;;  %v934_v0 = vpop.f32.mrb[43].mxu0  ;;  %2066 = vmatmul.mubr.msk.f32.gmra.mrb[26].mxu1 %vm267_vm1, %v1108_v44  ;;  %v3986_v44 = vld [vmem:[#allocation62_spill] sm:$0xff]  ;;  %v3987_v55 = vld [vmem:[#allocation59_spill] sm:$0xff] }
 0x249   :  { %v1109_v1 = vmax.f32 %v1077_v48, 0.0  ;;  %v1039_v4 = vmul.f32 %v3981_v3, %v933_v57 }
 0x24a   :  { %v937_v11 = vpop.f32.mrb[44].mxu0 }
 0x24b   :  { %v1078_v60 = vadd.f32 %v3218_v6, %v1039_v4  ;;  %v938_v13 = vadd.f32 %v937_v11, %v3022_v36  ;;  %v939_v5 = vpop.f32.mrb[45].mxu0  ;;  %2068 = vmatprep.mubr.msk.f32.mxu1 %vm267_vm1, %v1109_v1 }
 0x24d   :  { %v1110_v19 = vmax.f32 %v1078_v60, 0.0  ;;  %v1040_v31 = vmul.f32 %v3982_v22, %v938_v13  ;;  %v3988_v60 = vld [vmem:[#allocation61_spill] sm:$0xff] }
 0x24e   :  { %v942_v39 = vpop.f32.mrb[46].mxu0 }
 0x24f   :  { %v1079_v40 = vadd.f32 %v3218_v6, %v1040_v31  ;;  %v943_v43 = vadd.f32 %v942_v39, %v3983_v42  ;;  %v944_v51 = vpop.f32.mrb[47].mxu0  ;;  %2069 = vmatmul.mubr.msk.f32.gmra.mrb[28].mxu1 %vm267_vm1, %v1110_v19  ;;  %v3989_v42 = vld [vmem:[#allocation63_spill] sm:$0xff] }
 0x251   :  { %v1111_v46 = vmax.f32 %v1079_v40, 0.0  ;;  %v1041_v12 = vmul.f32 %v3984_v7, %v943_v43 }
 0x252   :  { %v947_v59 = vpop.f32.mrb[48].mxu0 }
 0x253   :  { %v1080_v36 = vadd.f32 %v3218_v6, %v1041_v12  ;;  %v948_v23 = vadd.f32 %v947_v59, %v3025_v62  ;;  %v949_v25 = vpop.f32.mrb[49].mxu0  ;;  %2071 = vmatprep.mubr.msk.f32.mxu1 %vm267_vm1, %v1111_v46 }
 0x255   :  { %v1112_v53 = vmax.f32 %v1080_v36, 0.0  ;;  %v1042_v29 = vmul.f32 %v3985_v28, %v948_v23  ;;  %v3990_v36 = vld [vmem:[#allocation64_spill] sm:$0xff] }
 0x256   :  { %v952_v34 = vpop.f32.mrb[50].mxu0 }
 0x257   :  { %v1081_v37 = vadd.f32 %v3218_v6, %v1042_v29  ;;  %v953_v26 = vadd.f32 %v952_v34, %v3986_v44  ;;  %v954_v47 = vpop.f32.mrb[51].mxu0  ;;  %2072 = vmatmul.mubr.msk.f32.gmra.mrb[30].mxu1 %vm267_vm1, %v1112_v53 }
 0x259   :  { %v1113_v48 = vmax.f32 %v1081_v37, 0.0  ;;  %v1043_v57 = vmul.f32 %v3987_v55, %v953_v26  ;;  %v3991_v37 = vld [vmem:[#allocation65_spill] sm:$0xff] }
 0x25a   :  { %v957_v0 = vpop.f32.mrb[52].mxu0 }
 0x25b   :  { %v1082_v62 = vadd.f32 %v3218_v6, %v1043_v57  ;;  %v958_v1 = vadd.f32 %v957_v0, %v3040_v8  ;;  %v959_v4 = vpop.f32.mrb[53].mxu0  ;;  %2074 = vmatprep.mubr.msk.f32.mxu1 %vm267_vm1, %v1113_v48  ;;  %v3992_v0 = vld [vmem:[#allocation66_spill] sm:$0xff] }
 0x25c   :  { %v3993_v4 = vld [vmem:[#allocation69_spill] sm:$0xff] }
 0x25d   :  { %v1114_v11 = vmax.f32 %v1082_v62, 0.0  ;;  %v1044_v13 = vmul.f32 %v3988_v60, %v958_v1 }
 0x25e   :  { %v962_v5 = vpop.f32.mrb[54].mxu0 }
 0x25f   :  { %v1083_v19 = vadd.f32 %v3218_v6, %v1044_v13  ;;  %v963_v31 = vadd.f32 %v962_v5, %v3043_v52  ;;  %v964_v39 = vpop.f32.mrb[55].mxu0  ;;  %2075 = vmatmul.mubr.msk.f32.gmra.mrb[32].mxu1 %vm267_vm1, %v1114_v11 }
 0x261   :  { %v1115_v40 = vmax.f32 %v1083_v19, 0.0  ;;  %v1045_v43 = vmul.f32 %v3989_v42, %v963_v31  ;;  %v3994_v19 = vld [vmem:[#allocation67_spill] sm:$0xff] }
 0x262   :  { %v967_v51 = vpop.f32.mrb[56].mxu0 }
 0x263   :  { %v1084_v8 = vadd.f32 %v3218_v6, %v1045_v43  ;;  %v968_v46 = vadd.f32 %v967_v51, %v3053_v21  ;;  %v969_v12 = vpop.f32.mrb[57].mxu0  ;;  %2077 = vmatprep.mubr.msk.f32.mxu1 %vm267_vm1, %v1115_v40  ;;  %v3995_v40 = vld [vmem:[#allocation72_spill] sm:$0xff] }
 0x265   :  { %v1116_v59 = vmax.f32 %v1084_v8, 0.0  ;;  %v1046_v23 = vmul.f32 %v3990_v36, %v968_v46  ;;  %v3996_v46 = vld [vmem:[#allocation68_spill] sm:$0xff] }
 0x266   :  { %v972_v25 = vpop.f32.mrb[58].mxu0 }
 0x267   :  { %v1085_v52 = vadd.f32 %v3218_v6, %v1046_v23  ;;  %v973_v53 = vadd.f32 %v972_v25, %v3056_v33  ;;  %v974_v29 = vpop.f32.mrb[59].mxu0  ;;  %2078 = vmatmul.mubr.msk.f32.gmra.mrb[34].mxu1 %vm267_vm1, %v1116_v59  ;;  %v3997_v25 = vld [vmem:[#allocation73_spill] sm:$0xff] }
 0x269   :  { %v1117_v34 = vmax.f32 %v1085_v52, 0.0  ;;  %v1047_v44 = vmul.f32 %v3991_v37, %v973_v53 }
 0x26a   :  { %v977_v26 = vpop.f32.mrb[60].mxu0 }
 0x26b   :  { %v1086_v21 = vadd.f32 %v3218_v6, %v1047_v44  ;;  %v978_v47 = vadd.f32 %v977_v26, %v3066_v56  ;;  %v979_v48 = vpop.f32.mrb[61].mxu0  ;;  %2080 = vmatprep.mubr.msk.f32.mxu1 %vm267_vm1, %v1117_v34  ;;  %v3998_v34 = vld [vmem:[#allocation70_spill] sm:$0xff] }
 0x26d   :  { %v1118_v57 = vmax.f32 %v1086_v21, 0.0  ;;  %v1048_v62 = vmul.f32 %v3992_v0, %v978_v47 }
 0x26e   :  { %v982_v1 = vpop.f32.mrb[62].mxu0 }
 0x26f   :  { %v1087_v33 = vadd.f32 %v3218_v6, %v1048_v62  ;;  %v983_v11 = vadd.f32 %v982_v1, %v3993_v4  ;;  %v984_v13 = vpop.f32.mrb[63].mxu0  ;;  %2081 = vmatmul.mubr.msk.f32.gmra.mrb[36].mxu1 %vm267_vm1, %v1118_v57  ;;  %v3999_v62 = vld [vmem:[#allocation71_spill] sm:$0xff] }
 0x271   :  { %v1119_v5 = vmax.f32 %v1087_v33, 0.0  ;;  %v1049_v31 = vmul.f32 %v3994_v19, %v983_v11  ;;  %v4000_v11 = vld [vmem:[#allocation76_spill] sm:$0xff] }
 0x272   :  { %v987_v39 = vpop.f32.mrb[64].mxu0 }
 0x273   :  { %v1088_v56 = vadd.f32 %v3218_v6, %v1049_v31  ;;  %v988_v43 = vadd.f32 %v987_v39, %v3995_v40  ;;  %v989_v51 = vpop.f32.mrb[65].mxu0  ;;  %2083 = vmatprep.mubr.msk.f32.mxu1 %vm267_vm1, %v1119_v5  ;;  %v4001_v39 = vld [vmem:[#allocation74_spill] sm:$0xff] }
 0x275   :  { %v1120_v8 = vmax.f32 %v1088_v56, 0.0  ;;  %v1050_v12 = vmul.f32 %v3996_v46, %v988_v43 }
 0x276   :  { %v992_v59 = vpop.f32.mrb[66].mxu0 }
 0x277   :  { %v1089_v23 = vadd.f32 %v3218_v6, %v1050_v12  ;;  %v993_v52 = vadd.f32 %v992_v59, %v3997_v25  ;;  %v994_v53 = vpop.f32.mrb[67].mxu0  ;;  %2084 = vmatmul.mubr.msk.f32.gmra.mrb[38].mxu1 %vm267_vm1, %v1120_v8 }
 0x279   :  { %v1121_v29 = vmax.f32 %v1089_v23, 0.0  ;;  %v1051_v44 = vmul.f32 %v3998_v34, %v993_v52 }
 0x27a   :  { %v997_v26 = vpop.f32.mrb[68].mxu0 }
 0x27b   :  { %v1090_v21 = vadd.f32 %v3218_v6, %v1051_v44  ;;  %v998_v47 = vadd.f32 %v997_v26, %v3092_v41  ;;  %v999_v48 = vpop.f32.mrb[69].mxu0  ;;  %2086 = vmatprep.mubr.msk.f32.mxu1 %vm267_vm1, %v1121_v29 }
 0x27d   :  { %v1122_v57 = vmax.f32 %v1090_v21, 0.0  ;;  %v1052_v1 = vmul.f32 %v3999_v62, %v998_v47 }
 0x27e   :  { %v1002_v33 = vpop.f32.mrb[70].mxu0 }
 0x27f   :  { %v1091_v4 = vadd.f32 %v3218_v6, %v1052_v1  ;;  %v1003_v13 = vadd.f32 %v1002_v33, %v4000_v11  ;;  %v1004_v5 = vpop.f32.mrb[71].mxu0  ;;  %2087 = vmatmul.mubr.msk.f32.gmra.mrb[40].mxu1 %vm267_vm1, %v1122_v57 }
 0x280   :  { %v2327_v5 = vld [vmem:[#allocation3 + $0x48] sm:$0xff] }
 0x281   :  { %v1123_v31 = vmax.f32 %v1091_v4, 0.0  ;;  %v1053_v56 = vmul.f32 %v4001_v39, %v1003_v13 }
 0x282   :  { %v1007_v40 = vpop.f32.mrb[72].mxu0 }
 0x283   :  { %v1092_v41 = vadd.f32 %v3218_v6, %v1053_v56  ;;  %v1008_v43 = vadd.f32 %v1007_v40, %v3105_v16  ;;  %v1009_v51 = vpop.f32.mrb[73].mxu0  ;;  %2089 = vmatprep.mubr.msk.f32.mxu1 %vm267_vm1, %v1123_v31 }
 0x285   :  { %v1124_v8 = vmax.f32 %v1092_v41, 0.0  ;;  %v1054_v12 = vmul.f32 %v3087_v32, %v1008_v43 }
 0x286   :  { %v1012_v59 = vpop.f32.mrb[74].mxu0 }
 0x287   :  { %v1093_v23 = vadd.f32 %v3218_v6, %v1054_v12  ;;  %v1013_v25 = vadd.f32 %v1012_v59, %v3108_v17  ;;  %v1014_v52 = vpop.f32.mrb[75].mxu0  ;;  %2090 = vmatmul.mubr.msk.f32.gmra.mrb[42].mxu1 %vm267_vm1, %v1124_v8 }
 0x289   :  { %v1125_v53 = vmax.f32 %v1093_v23, 0.0  ;;  %v1055_v29 = vmul.f32 %v3097_v2, %v1013_v25 }
 0x28a   :  { %v1017_v44 = vpop.f32.mrb[76].mxu0 }
 0x28b   :  { %v1094_v16 = vadd.f32 %v3218_v6, %v1055_v29  ;;  %v1018_v26 = vadd.f32 %v1017_v44, %v3116_v49  ;;  %v1019_v21 = vpop.f32.mrb[77].mxu0  ;;  %2092 = vmatprep.mubr.msk.f32.mxu1 %vm267_vm1, %v1125_v53 }
 0x28d   :  { %v1126_v47 = vmax.f32 %v1094_v16, 0.0  ;;  %v1056_v48 = vmul.f32 %v3100_v9, %v1018_v26 }
 0x28e   :  { %v1022_v57 = vpop.f32.mrb[78].mxu0 }
 0x28f   :  { %v1095_v17 = vadd.f32 %v3218_v6, %v1056_v48  ;;  %v1023_v1 = vadd.f32 %v1022_v57, %v3119_v15  ;;  %v1024_v33 = vpop.f32.mrb[79].mxu0  ;;  %2093 = vmatmul.mubr.msk.f32.gmra.mrb[44].mxu1 %vm267_vm1, %v1126_v47 }
 0x291   :  { %v1127_v4 = vmax.f32 %v1095_v17, 0.0  ;;  %v1057_v11 = vmul.f32 %v3110_v18, %v1023_v1 }
 0x293   :  { %v1096_v13 = vadd.f32 %v3218_v6, %v1057_v11  ;;  %2095 = vmatprep.mubr.msk.f32.mxu1 %vm267_vm1, %v1127_v4 }
 0x295   :  { %v1128_v49 = vmax.f32 %v1096_v13, 0.0 }
 0x297   :  { %2096 = vmatmul.mubr.msk.f32.gmra.mrb[46].mxu1 %vm267_vm1, %v1128_v49 }
 0x298   :  { %1574 = vmatprep.mubr.f32.mxu1 %v2327_v5 }
 0x2f2   :  { %v2052_v31 = vpop.f32.mrb[16].mxu1 }
 0x2f3   :  { %v3348_v56 = vmul.f32 %v3962_v35, %v2052_v31  ;;  %v1299_v15 = vpop.f32.mrb[17].mxu1 }
 0x2f4   :  { %v3351_v40 = vmul.f32 %v3960_v20, %v1299_v15 }
 0x2f6   :  { %v2179_v41 = vpack.c.bf16 %v3348_v56, %v3351_v40 }
 0x2f8   :  { %2180 = vmatpush1.bf16.msra.mxu0 %v2179_v41  ;;  %2242 = vmatpush1.bf16.msra.mxu1 %v2179_v41 }
 0x2f9   :  { %2181 = vmatprep.subr.bf16.mxu0 %v3893_v63  ;;  %2227 = vmatprep.subr.bf16.mxu1 %v3893_v63 }
 0x2fa   :  { %v2055_v6 = vpop.f32.mrb[18].mxu1 }
 0x2fb   :  { %v3358_v43 = vmul.f32 %v3965_v10, %v2055_v6  ;;  %v1309_v51 = vpop.f32.mrb[19].mxu1 }
 0x2fc   :  { %v3361_v8 = vmul.f32 %v3963_v54, %v1309_v51 }
 0x2fe   :  { %v2182_v12 = vpack.c.bf16 %v3358_v43, %v3361_v8 }
 0x300   :  { %2183 = vmatpush1.bf16.msra.mxu0 %v2182_v12  ;;  %2243 = vmatpush1.bf16.msra.mxu1 %v2182_v12 }
 0x301   :  { %2184 = vmatprep.subr.bf16.mxu0 %v3893_v63  ;;  %2228 = vmatprep.subr.bf16.mxu1 %v3893_v63 }
 0x302   :  { %v2058_v59 = vpop.f32.mrb[20].mxu1 }
 0x303   :  { %v3368_v23 = vmul.f32 %v3967_v61, %v2058_v59  ;;  %v1319_v25 = vpop.f32.mrb[21].mxu1 }
 0x304   :  { %v3371_v52 = vmul.f32 %v3966_v30, %v1319_v25 }
 0x306   :  { %v2185_v53 = vpack.c.bf16 %v3368_v23, %v3371_v52 }
 0x308   :  { %2186 = vmatpush1.bf16.msra.mxu0 %v2185_v53  ;;  %2244 = vmatpush1.bf16.msra.mxu1 %v2185_v53 }
 0x309   :  { %2187 = vmatprep.subr.bf16.mxu0 %v3893_v63  ;;  %2229 = vmatprep.subr.bf16.mxu1 %v3893_v63 }
 0x30a   :  { %v2061_v29 = vpop.f32.mrb[22].mxu1 }
 0x30b   :  { %v3378_v44 = vmul.f32 %v3970_v38, %v2061_v29  ;;  %v1329_v16 = vpop.f32.mrb[23].mxu1 }
 0x30c   :  { %v3381_v26 = vmul.f32 %v3968_v24, %v1329_v16 }
 0x30e   :  { %v2188_v21 = vpack.c.bf16 %v3378_v44, %v3381_v26 }
 0x310   :  { %2189 = vmatpush1.bf16.msra.mxu0 %v2188_v21  ;;  %2245 = vmatpush1.bf16.msra.mxu1 %v2188_v21 }
 0x311   :  { %2190 = vmatprep.subr.bf16.mxu0 %v3893_v63  ;;  %2230 = vmatprep.subr.bf16.mxu1 %v3893_v63 }
 0x312   :  { %v2064_v47 = vpop.f32.mrb[24].mxu1 }
 0x313   :  { %v3388_v48 = vmul.f32 %v3974_v14, %v2064_v47  ;;  %v1339_v57 = vpop.f32.mrb[25].mxu1 }
 0x314   :  { %v3391_v17 = vmul.f32 %v3972_v58, %v1339_v57 }
 0x316   :  { %v2191_v1 = vpack.c.bf16 %v3388_v48, %v3391_v17 }
 0x318   :  { %2192 = vmatpush1.bf16.msra.mxu0 %v2191_v1  ;;  %2246 = vmatpush1.bf16.msra.mxu1 %v2191_v1 }
 0x319   :  { %2193 = vmatprep.subr.bf16.mxu0 %v3893_v63  ;;  %2231 = vmatprep.subr.bf16.mxu1 %v3893_v63 }
 0x31a   :  { %v2067_v33 = vpop.f32.mrb[26].mxu1 }
 0x31b   :  { %v3398_v4 = vmul.f32 %v3978_v27, %v2067_v33  ;;  %v1349_v11 = vpop.f32.mrb[27].mxu1 }
 0x31c   :  { %v3401_v13 = vmul.f32 %v3976_v50, %v1349_v11 }
 0x31e   :  { %v2194_v49 = vpack.c.bf16 %v3398_v4, %v3401_v13 }
 0x320   :  { %2195 = vmatpush1.bf16.msra.mxu0 %v2194_v49  ;;  %2247 = vmatpush1.bf16.msra.mxu1 %v2194_v49 }
 0x321   :  { %2196 = vmatprep.subr.bf16.mxu0 %v3893_v63  ;;  %2232 = vmatprep.subr.bf16.mxu1 %v3893_v63 }
 0x322   :  { %v2070_v5 = vpop.f32.mrb[28].mxu1 }
 0x323   :  { %v3408_v31 = vmul.f32 %v3981_v3, %v2070_v5  ;;  %v1359_v15 = vpop.f32.mrb[29].mxu1 }
 0x324   :  { %v3411_v41 = vmul.f32 %v3979_v45, %v1359_v15 }
 0x326   :  { %v2197_v6 = vpack.c.bf16 %v3408_v31, %v3411_v41 }
 0x328   :  { %2198 = vmatpush1.bf16.msra.mxu0 %v2197_v6  ;;  %2248 = vmatpush1.bf16.msra.mxu1 %v2197_v6 }
 0x329   :  { %2199 = vmatprep.subr.bf16.mxu0 %v3893_v63  ;;  %2233 = vmatprep.subr.bf16.mxu1 %v3893_v63 }
 0x32a   :  { %v2073_v51 = vpop.f32.mrb[30].mxu1 }
 0x32b   :  { %v3418_v12 = vmul.f32 %v3984_v7, %v2073_v51  ;;  %v1369_v59 = vpop.f32.mrb[31].mxu1 }
 0x32c   :  { %v3421_v25 = vmul.f32 %v3982_v22, %v1369_v59 }
 0x32e   :  { %v2200_v53 = vpack.c.bf16 %v3418_v12, %v3421_v25 }
 0x330   :  { %2201 = vmatpush1.bf16.msra.mxu0 %v2200_v53  ;;  %2249 = vmatpush1.bf16.msra.mxu1 %v2200_v53 }
 0x331   :  { %2202 = vmatprep.subr.bf16.mxu0 %v3893_v63  ;;  %2234 = vmatprep.subr.bf16.mxu1 %v3893_v63 }
 0x332   :  { %v2076_v29 = vpop.f32.mrb[32].mxu1 }
 0x333   :  { %v3428_v16 = vmul.f32 %v3987_v55, %v2076_v29  ;;  %v1379_v21 = vpop.f32.mrb[33].mxu1 }
 0x334   :  { %v3431_v47 = vmul.f32 %v3985_v28, %v1379_v21 }
 0x336   :  { %v2203_v57 = vpack.c.bf16 %v3428_v16, %v3431_v47 }
 0x338   :  { %2204 = vmatpush1.bf16.msra.mxu0 %v2203_v57  ;;  %2250 = vmatpush1.bf16.msra.mxu1 %v2203_v57 }
 0x339   :  { %2205 = vmatprep.subr.bf16.mxu0 %v3893_v63  ;;  %2235 = vmatprep.subr.bf16.mxu1 %v3893_v63 }
 0x33a   :  { %v2079_v1 = vpop.f32.mrb[34].mxu1 }
 0x33b   :  { %v3438_v33 = vmul.f32 %v3989_v42, %v2079_v1  ;;  %v1389_v11 = vpop.f32.mrb[35].mxu1 }
 0x33c   :  { %v3441_v49 = vmul.f32 %v3988_v60, %v1389_v11 }
 0x33e   :  { %v2206_v5 = vpack.c.bf16 %v3438_v33, %v3441_v49 }
 0x340   :  { %2207 = vmatpush1.bf16.msra.mxu0 %v2206_v5  ;;  %2251 = vmatpush1.bf16.msra.mxu1 %v2206_v5 }
 0x341   :  { %2208 = vmatprep.subr.bf16.mxu0 %v3893_v63  ;;  %2236 = vmatprep.subr.bf16.mxu1 %v3893_v63 }
 0x342   :  { %v2082_v15 = vpop.f32.mrb[36].mxu1 }
 0x343   :  { %v3448_v6 = vmul.f32 %v3991_v37, %v2082_v15  ;;  %v1399_v51 = vpop.f32.mrb[37].mxu1 }
 0x344   :  { %v3451_v59 = vmul.f32 %v3990_v36, %v1399_v51 }
 0x346   :  { %v2209_v53 = vpack.c.bf16 %v3448_v6, %v3451_v59 }
 0x348   :  { %2210 = vmatpush1.bf16.msra.mxu0 %v2209_v53  ;;  %2252 = vmatpush1.bf16.msra.mxu1 %v2209_v53 }
 0x349   :  { %2211 = vmatprep.subr.bf16.mxu0 %v3893_v63  ;;  %2237 = vmatprep.subr.bf16.mxu1 %v3893_v63 }
 0x34a   :  { %v2085_v29 = vpop.f32.mrb[38].mxu1 }
 0x34b   :  { %v3458_v21 = vmul.f32 %v3994_v19, %v2085_v29  ;;  %v1409_v57 = vpop.f32.mrb[39].mxu1 }
 0x34c   :  { %v3461_v1 = vmul.f32 %v3992_v0, %v1409_v57 }
 0x34e   :  { %v2212_v11 = vpack.c.bf16 %v3458_v21, %v3461_v1 }
 0x350   :  { %2213 = vmatpush1.bf16.msra.mxu0 %v2212_v11  ;;  %2253 = vmatpush1.bf16.msra.mxu1 %v2212_v11 }
 0x351   :  { %2214 = vmatprep.subr.bf16.mxu0 %v3893_v63  ;;  %2238 = vmatprep.subr.bf16.mxu1 %v3893_v63 }
 0x352   :  { %v2088_v5 = vpop.f32.mrb[40].mxu1 }
 0x353   :  { %v3468_v15 = vmul.f32 %v3998_v34, %v2088_v5  ;;  %v1419_v51 = vpop.f32.mrb[41].mxu1 }
 0x354   :  { %v3471_v53 = vmul.f32 %v3996_v46, %v1419_v51 }
 0x355   :  { %4002 = vst [vmem:[#allocation6_spill] sm:$0xff] %v3468_v15 }
 0x356   :  { %v2215_v29 = vpack.c.bf16 %v3468_v15, %v3471_v53 }
 0x358   :  { %2216 = vmatpush1.bf16.msra.mxu0 %v2215_v29  ;;  %2254 = vmatpush1.bf16.msra.mxu1 %v2215_v29 }
 0x359   :  { %2217 = vmatprep.subr.bf16.mxu0 %v3893_v63  ;;  %2239 = vmatprep.subr.bf16.mxu1 %v3893_v63 }
 0x35a   :  { %v2091_v57 = vpop.f32.mrb[42].mxu1 }
 0x35b   :  { %v3478_v11 = vmul.f32 %v4001_v39, %v2091_v57  ;;  %v1429_v19 = vpop.f32.mrb[43].mxu1 }
 0x35c   :  { %v3481_v5 = vmul.f32 %v3999_v62, %v1429_v19 }
 0x35d   :  { %4003 = vst [vmem:[#allocation8_spill] sm:$0xff] %v3478_v11 }
 0x35e   :  { %v2218_v51 = vpack.c.bf16 %v3478_v11, %v3481_v5 }
 0x360   :  { %2219 = vmatpush1.bf16.msra.mxu0 %v2218_v51  ;;  %2255 = vmatpush1.bf16.msra.mxu1 %v2218_v51 }
 0x361   :  { %2220 = vmatprep.subr.bf16.mxu0 %v3893_v63  ;;  %2240 = vmatprep.subr.bf16.mxu1 %v3893_v63 }
 0x362   :  { %v2094_v29 = vpop.f32.mrb[44].mxu1 }
 0x363   :  { %v3488_v34 = vmul.f32 %v3097_v2, %v2094_v29  ;;  %v1439_v15 = vpop.f32.mrb[45].mxu1  ;;  %v2328_v2 = vld [vmem:[#allocation3] sm:$0xff] }
 0x364   :  { %v3491_v57 = vmul.f32 %v3087_v32, %v1439_v15  ;;  %v2332_v32 = vld [vmem:[#allocation3 + $0x10] sm:$0xff] }
 0x365   :  { %4004 = vst [vmem:[#allocation7_spill] sm:$0xff] %v3488_v34 }
 0x366   :  { %4005 = vst [vmem:[#allocation10_spill] sm:$0xff] %v3491_v57  ;;  %v2221_v19 = vpack.c.bf16 %v3488_v34, %v3491_v57  ;;  %v2330_v34 = vld [vmem:[#allocation3 + $0x18] sm:$0xff] }
 0x368   :  { %2222 = vmatpush1.bf16.msra.mxu0 %v2221_v19  ;;  %2256 = vmatpush1.bf16.msra.mxu1 %v2221_v19  ;;  %v2329_v19 = vld [vmem:[#allocation3 + $0x40] sm:$0xff] }
 0x369   :  { %2223 = vmatprep.subr.bf16.mxu0 %v3893_v63  ;;  %2241 = vmatprep.subr.bf16.mxu1 %v3893_v63  ;;  %v2331_v63 = vld [vmem:[#allocation3 + $0x58] sm:$0xff] }
 0x36a   :  { %v2097_v51 = vpop.f32.mrb[46].mxu1 }
 0x36b   :  { %v3498_v39 = vmul.f32 %v3110_v18, %v2097_v51  ;;  %v1449_v11 = vpop.f32.mrb[47].mxu1  ;;  %v2333_v51 = vld [vmem:[#allocation3 + $0x50] sm:$0xff]  ;;  %v2334_v18 = vld [vmem:[#allocation3 + $0x28] sm:$0xff] }
 0x36c   :  { %v3501_v29 = vmul.f32 %v3100_v9, %v1449_v11  ;;  %v2335_v11 = vld [vmem:[#allocation3 + $0x68] sm:$0xff]  ;;  %v2336_v9 = vld [vmem:[#allocation3 + $0x20] sm:$0xff] }
 0x36d   :  { %4006 = vst [vmem:[#allocation9_spill] sm:$0xff] %v3498_v39 }
 0x36e   :  { %4007 = vst [vmem:[#allocation12_spill] sm:$0xff] %v3501_v29  ;;  %v2224_v15 = vpack.c.bf16 %v3498_v39, %v3501_v29  ;;  %v2337_v39 = vld [vmem:[#allocation3 + $0x60] sm:$0xff] }
 0x370   :  { %2225 = vmatpush1.bf16.msra.mxu0 %v2224_v15  ;;  %2257 = vmatpush1.bf16.msra.mxu1 %v2224_v15  ;;  %v2338_v15 = vld [vmem:[#allocation3 + $0x38] sm:$0xff] }
 0x373   :  { %1555 = vmatmul.mubr.f32.vlgmr.msra.gmra.mrb[80].mxu0 %v2328_v2  ;;  %1575 = vmatmul.mubr.f32.vlgmr.msra.gmra.mrb[48].mxu1 %v2329_v19  ;;  %v2339_v2 = vld [vmem:[#allocation3 + $0x78] sm:$0xff]  ;;  %v2340_v19 = vld [vmem:[#allocation3 + $0x30] sm:$0xff] }
 0x374   :  { %1559 = vmatprep.mubr.f32.mxu0 %v2330_v34  ;;  %1579 = vmatprep.mubr.f32.mxu1 %v2331_v63  ;;  %v2341_v34 = vld [vmem:[#allocation3 + $0x70] sm:$0xff]  ;;  %v2342_v63 = vld [vmem:[#allocation3 + $0x88] sm:$0xff] }
 0x377   :  { %1560 = vmatmul.mubr.f32.gmra.mrb[82].mxu0 %v2332_v32  ;;  %1580 = vmatmul.mubr.f32.gmra.mrb[50].mxu1 %v2333_v51  ;;  %v2343_v32 = vld [vmem:[#allocation3 + $0x80] sm:$0xff]  ;;  %v2344_v51 = vld [vmem:[#allocation3 + $0x98] sm:$0xff] }
 0x378   :  { %1564 = vmatprep.mubr.f32.mxu0 %v2334_v18  ;;  %1584 = vmatprep.mubr.f32.mxu1 %v2335_v11  ;;  %v2345_v18 = vld [vmem:[#allocation3 + $0x90] sm:$0xff]  ;;  %v2346_v11 = vld [vmem:[#allocation3 + $0xa8] sm:$0xff] }
 0x37b   :  { %1565 = vmatmul.mubr.f32.gmra.mrb[84].mxu0 %v2336_v9  ;;  %1585 = vmatmul.mubr.f32.gmra.mrb[52].mxu1 %v2337_v39  ;;  %v2347_v9 = vld [vmem:[#allocation3 + $0xa0] sm:$0xff]  ;;  %v2348_v39 = vld [vmem:[#allocation3 + $0xb8] sm:$0xff] }
 0x37c   :  { %1569 = vmatprep.mubr.f32.mxu0 %v2338_v15  ;;  %1589 = vmatprep.mubr.f32.mxu1 %v2339_v2  ;;  %v2349_v15 = vld [vmem:[#allocation3 + $0xb0] sm:$0xff]  ;;  %v2350_v2 = vld [vmem:[#allocation3 + $0xc8] sm:$0xff] }
 0x37f   :  { %1570 = vmatmul.mubr.f32.gmra.mrb[86].mxu0 %v2340_v19  ;;  %1590 = vmatmul.mubr.f32.gmra.mrb[54].mxu1 %v2341_v34  ;;  %v2351_v19 = vld [vmem:[#allocation3 + $0xc0] sm:$0xff]  ;;  %v2352_v34 = vld [vmem:[#allocation3 + $0xd8] sm:$0xff] }
 0x380   :  { %1594 = vmatprep.mubr.f32.mxu1 %v2342_v63  ;;  %v2353_v63 = vld [vmem:[#allocation3 + $0xd0] sm:$0xff] }
 0x383   :  { %1595 = vmatmul.mubr.f32.gmra.mrb[56].mxu1 %v2343_v32  ;;  %v2354_v32 = vld [vmem:[#allocation3 + $0xe8] sm:$0xff] }
 0x384   :  { %1599 = vmatprep.mubr.f32.mxu1 %v2344_v51  ;;  %v2355_v51 = vld [vmem:[#allocation3 + $0xe0] sm:$0xff] }
 0x387   :  { %1600 = vmatmul.mubr.f32.gmra.mrb[58].mxu1 %v2345_v18  ;;  %v2356_v18 = vld [vmem:[#allocation3 + $0xf8] sm:$0xff] }
 0x388   :  { %1604 = vmatprep.mubr.f32.mxu1 %v2346_v11  ;;  %v2357_v11 = vld [vmem:[#allocation3 + $0xf0] sm:$0xff] }
 0x38b   :  { %1605 = vmatmul.mubr.f32.gmra.mrb[60].mxu1 %v2347_v9  ;;  %v2358_v9 = vld [vmem:[#allocation3 + $0x108] sm:$0xff] }
 0x38c   :  { %1609 = vmatprep.mubr.f32.mxu1 %v2348_v39  ;;  %v2359_v39 = vld [vmem:[#allocation3 + $0x100] sm:$0xff] }
 0x38f   :  { %1610 = vmatmul.mubr.f32.gmra.mrb[62].mxu1 %v2349_v15  ;;  %v2360_v15 = vld [vmem:[#allocation3 + $0x118] sm:$0xff] }
 0x390   :  { %1614 = vmatprep.mubr.f32.mxu1 %v2350_v2  ;;  %v2361_v2 = vld [vmem:[#allocation3 + $0x110] sm:$0xff] }
 0x393   :  { %1615 = vmatmul.mubr.f32.gmra.mrb[64].mxu1 %v2351_v19  ;;  %v2362_v19 = vld [vmem:[#allocation3 + $0x128] sm:$0xff] }
 0x394   :  { %1619 = vmatprep.mubr.f32.mxu1 %v2352_v34  ;;  %v2363_v34 = vld [vmem:[#allocation3 + $0x120] sm:$0xff] }
 0x397   :  { %1620 = vmatmul.mubr.f32.gmra.mrb[66].mxu1 %v2353_v63  ;;  %v2364_v63 = vld [vmem:[#allocation3 + $0x138] sm:$0xff] }
 0x398   :  { %1624 = vmatprep.mubr.f32.mxu1 %v2354_v32  ;;  %v2365_v32 = vld [vmem:[#allocation3 + $0x130] sm:$0xff] }
 0x39b   :  { %1625 = vmatmul.mubr.f32.gmra.mrb[68].mxu1 %v2355_v51  ;;  %v2366_v51 = vld [vmem:[#allocation3 + $0x148] sm:$0xff] }
 0x39c   :  { %1629 = vmatprep.mubr.f32.mxu1 %v2356_v18  ;;  %v2367_v18 = vld [vmem:[#allocation3 + $0x140] sm:$0xff] }
 0x39f   :  { %1630 = vmatmul.mubr.f32.gmra.mrb[70].mxu1 %v2357_v11  ;;  %v2368_v11 = vld [vmem:[#allocation3 + $0x158] sm:$0xff] }
 0x3a0   :  { %1634 = vmatprep.mubr.f32.mxu1 %v2358_v9  ;;  %v2369_v9 = vld [vmem:[#allocation3 + $0x150] sm:$0xff] }
 0x3a3   :  { %1635 = vmatmul.mubr.f32.gmra.mrb[72].mxu1 %v2359_v39  ;;  %v2370_v39 = vld [vmem:[#allocation3 + $0x168] sm:$0xff] }
 0x3a4   :  { %1639 = vmatprep.mubr.f32.mxu1 %v2360_v15  ;;  %v2371_v15 = vld [vmem:[#allocation3 + $0x160] sm:$0xff] }
 0x3a7   :  { %1640 = vmatmul.mubr.f32.gmra.mrb[74].mxu1 %v2361_v2  ;;  %v2372_v2 = vld [vmem:[#allocation3 + $0x178] sm:$0xff] }
 0x3a8   :  { %1644 = vmatprep.mubr.f32.mxu1 %v2362_v19  ;;  %v2373_v19 = vld [vmem:[#allocation3 + $0x170] sm:$0xff] }
 0x3ab   :  { %1645 = vmatmul.mubr.f32.gmra.mrb[76].mxu1 %v2363_v34  ;;  %v2374_v34 = vld [vmem:[#allocation3 + $0x188] sm:$0xff] }
 0x3ac   :  { %1649 = vmatprep.mubr.f32.mxu1 %v2364_v63  ;;  %v2375_v63 = vld [vmem:[#allocation3 + $0x180] sm:$0xff] }
 0x3af   :  { %1650 = vmatmul.mubr.f32.gmra.mrb[78].mxu1 %v2365_v32  ;;  %v2376_v32 = vld [vmem:[#allocation3 + $0x198] sm:$0xff] }
 0x3b0   :  { %1654 = vmatprep.mubr.f32.mxu1 %v2366_v51  ;;  %v2377_v51 = vld [vmem:[#allocation3 + $0x190] sm:$0xff] }
 0x3b3   :  { %1655 = vmatmul.mubr.f32.gmra.mrb[80].mxu1 %v2367_v18  ;;  %v2378_v18 = vld [vmem:[#allocation3 + $0x1a8] sm:$0xff] }
 0x3b4   :  { %1659 = vmatprep.mubr.f32.mxu1 %v2368_v11  ;;  %v2379_v11 = vld [vmem:[#allocation3 + $0x1a0] sm:$0xff] }
 0x3b7   :  { %1660 = vmatmul.mubr.f32.gmra.mrb[82].mxu1 %v2369_v9  ;;  %v2380_v9 = vld [vmem:[#allocation3 + $0x1b8] sm:$0xff] }
 0x3b8   :  { %1664 = vmatprep.mubr.f32.mxu1 %v2370_v39  ;;  %v2381_v39 = vld [vmem:[#allocation3 + $0x1b0] sm:$0xff] }
 0x3bb   :  { %1665 = vmatmul.mubr.f32.gmra.mrb[84].mxu1 %v2371_v15  ;;  %v2382_v15 = vld [vmem:[#allocation3 + $0x1c8] sm:$0xff] }
 0x3bc   :  { %1669 = vmatprep.mubr.f32.mxu1 %v2372_v2  ;;  %v2383_v2 = vld [vmem:[#allocation3 + $0x1c0] sm:$0xff] }
 0x3bf   :  { %1670 = vmatmul.mubr.f32.gmra.mrb[86].mxu1 %v2373_v19  ;;  %v2384_v19 = vld [vmem:[#allocation3 + $0x1d8] sm:$0xff] }
 0x3c0   :  { %1674 = vmatprep.mubr.f32.mxu1 %v2374_v34  ;;  %v2385_v34 = vld [vmem:[#allocation3 + $0x1d0] sm:$0xff] }
 0x3c3   :  { %1675 = vmatmul.mubr.f32.gmra.mrb[88].mxu1 %v2375_v63  ;;  %v2386_v63 = vld [vmem:[#allocation3 + $0x1e8] sm:$0xff] }
 0x3c4   :  { %1679 = vmatprep.mubr.f32.mxu1 %v2376_v32  ;;  %v2387_v32 = vld [vmem:[#allocation3 + $0x1e0] sm:$0xff] }
 0x3c7   :  { %1680 = vmatmul.mubr.f32.gmra.mrb[90].mxu1 %v2377_v51  ;;  %v2388_v51 = vld [vmem:[#allocation3 + $0x1f8] sm:$0xff] }
 0x3c8   :  { %1684 = vmatprep.mubr.f32.mxu1 %v2378_v18  ;;  %v2389_v18 = vld [vmem:[#allocation3 + $0x1f0] sm:$0xff] }
 0x3cb   :  { %1685 = vmatmul.mubr.f32.gmra.mrb[92].mxu1 %v2379_v11 }
 0x3cc   :  { %1689 = vmatprep.mubr.f32.mxu1 %v2380_v9 }
 0x3cf   :  { %1690 = vmatmul.mubr.f32.gmra.mrb[94].mxu1 %v2381_v39 }
 0x3d0   :  { %1694 = vmatprep.mubr.f32.mxu1 %v2382_v15 }
 0x3d3   :  { %1695 = vmatmul.mubr.f32.gmra.mrb[96].mxu1 %v2383_v2 }
 0x3d4   :  { %1699 = vmatprep.mubr.f32.mxu1 %v2384_v19  ;;  %v3510_v19 = vld [vmem:[%s3742_s8] ss:$0 sm:$0xff] }
 0x3d7   :  { %1700 = vmatmul.mubr.f32.gmra.mrb[98].mxu1 %v2385_v34 }
 0x3d8   :  { %1704 = vmatprep.mubr.f32.mxu1 %v2386_v63 }
 0x3db   :  { %1705 = vmatmul.mubr.f32.gmra.mrb[100].mxu1 %v2387_v32 }
 0x3dc   :  { %1709 = vmatprep.mubr.f32.mxu1 %v2388_v51 }
 0x3df   :  { %1710 = vmatmul.mubr.f32.gmra.mrb[102].mxu1 %v2389_v18 }
 0x446   :  { %v1556_v11 = vpop.f32.mrb[80].mxu0  ;;  %v1576_v9 = vpop.f32.mrb[48].mxu1 }
 0x447   :  { %v1557_v39 = vadd.f32 %v1556_v11, %v3351_v40  ;;  %v1577_v15 = vadd.f32 %v1576_v9, %v3371_v52  ;;  %v1578_v29 = vpop.f32.mrb[49].mxu1  ;;  %v1558_v2 = vpop.f32.mrb[81].mxu0 }
 0x449   :  { %v1715_v34 = vmul.f32 %v3960_v20, %v1557_v39  ;;  %v1719_v63 = vmul.f32 %v3966_v30, %v1577_v15 }
 0x44a   :  { %v1561_v32 = vpop.f32.mrb[82].mxu0  ;;  %v1581_v51 = vpop.f32.mrb[50].mxu1 }
 0x44b   :  { %v1754_v18 = vadd.f32 %v3510_v19, %v1715_v34  ;;  %v1758_v57 = vadd.f32 %v3510_v19, %v1719_v63  ;;  %v1562_v40 = vadd.f32 %v1561_v32, %v3348_v56  ;;  %v1582_v52 = vadd.f32 %v1581_v51, %v3368_v23  ;;  %v1583_v29 = vpop.f32.mrb[51].mxu1  ;;  %v1563_v11 = vpop.f32.mrb[83].mxu0 }
 0x44d   :  { %1786 = vst.msk [vmem:[%s3743_s9] sm:$0xff] %vm73_vm0, %v1754_v18  ;;  %1790 = vst.msk [vmem:[%s3743_s9 + $0x20] sm:$0xff] %vm73_vm0, %v1758_v57  ;;  %v1716_v20 = vmul.f32 %v3962_v35, %v1562_v40  ;;  %v1720_v30 = vmul.f32 %v3967_v61, %v1582_v52 }
 0x44e   :  { %v1566_v9 = vpop.f32.mrb[84].mxu0  ;;  %v1586_v56 = vpop.f32.mrb[52].mxu1 }
 0x44f   :  { %v1755_v23 = vadd.f32 %v3510_v19, %v1716_v20  ;;  %v1759_v39 = vadd.f32 %v3510_v19, %v1720_v30  ;;  %v1567_v15 = vadd.f32 %v1566_v9, %v3361_v8  ;;  %v1587_v2 = vadd.f32 %v1586_v56, %v3381_v26  ;;  %v1588_v34 = vpop.f32.mrb[53].mxu1  ;;  %v1568_v63 = vpop.f32.mrb[85].mxu0 }
 0x451   :  { %1787 = vst.msk [vmem:[%s3743_s9 + $0x8] sm:$0xff] %vm73_vm0, %v1755_v23  ;;  %1791 = vst.msk [vmem:[%s3743_s9 + $0x28] sm:$0xff] %vm73_vm0, %v1759_v39  ;;  %v1717_v35 = vmul.f32 %v3963_v54, %v1567_v15  ;;  %v1721_v61 = vmul.f32 %v3968_v24, %v1587_v2 }
 0x452   :  { %v1571_v57 = vpop.f32.mrb[86].mxu0  ;;  %v1591_v8 = vpop.f32.mrb[54].mxu1 }
 0x453   :  { %v1756_v26 = vadd.f32 %v3510_v19, %v1717_v35  ;;  %v1760_v32 = vadd.f32 %v3510_v19, %v1721_v61  ;;  %v1572_v51 = vadd.f32 %v1571_v57, %v3358_v43  ;;  %v1592_v18 = vadd.f32 %v1591_v8, %v3378_v44  ;;  %v1593_v40 = vpop.f32.mrb[55].mxu1  ;;  %v1573_v52 = vpop.f32.mrb[87].mxu0 }
 0x455   :  { %1788 = vst.msk [vmem:[%s3743_s9 + $0x10] sm:$0xff] %vm73_vm0, %v1756_v26  ;;  %1792 = vst.msk [vmem:[%s3743_s9 + $0x30] sm:$0xff] %vm73_vm0, %v1760_v32  ;;  %v1718_v54 = vmul.f32 %v3965_v10, %v1572_v51  ;;  %v1722_v24 = vmul.f32 %v3970_v38, %v1592_v18 }
 0x456   :  { %v1596_v29 = vpop.f32.mrb[56].mxu1 }
 0x457   :  { %v1757_v43 = vadd.f32 %v3510_v19, %v1718_v54  ;;  %v1761_v44 = vadd.f32 %v3510_v19, %v1722_v24  ;;  %v1597_v11 = vadd.f32 %v1596_v29, %v3391_v17  ;;  %v1598_v20 = vpop.f32.mrb[57].mxu1 }
 0x459   :  { %1789 = vst.msk [vmem:[%s3743_s9 + $0x18] sm:$0xff] %vm73_vm0, %v1757_v43  ;;  %1793 = vst.msk [vmem:[%s3743_s9 + $0x38] sm:$0xff] %vm73_vm0, %v1761_v44  ;;  %v1723_v10 = vmul.f32 %v3972_v58, %v1597_v11 }
 0x45a   :  { %v1601_v38 = vpop.f32.mrb[58].mxu1 }
 0x45b   :  { %v1762_v30 = vadd.f32 %v3510_v19, %v1723_v10  ;;  %v1602_v9 = vadd.f32 %v1601_v38, %v3388_v48  ;;  %v1603_v56 = vpop.f32.mrb[59].mxu1 }
 0x45d   :  { %1794 = vst.msk [vmem:[%s3743_s9 + $0x40] sm:$0xff] %vm73_vm0, %v1762_v30  ;;  %v1724_v17 = vmul.f32 %v3974_v14, %v1602_v9 }
 0x45e   :  { %v1606_v23 = vpop.f32.mrb[60].mxu1 }
 0x45f   :  { %v1763_v39 = vadd.f32 %v3510_v19, %v1724_v17  ;;  %v1607_v15 = vadd.f32 %v1606_v23, %v3401_v13  ;;  %v1608_v2 = vpop.f32.mrb[61].mxu1 }
 0x461   :  { %1795 = vst.msk [vmem:[%s3743_s9 + $0x48] sm:$0xff] %vm73_vm0, %v1763_v39  ;;  %v1725_v58 = vmul.f32 %v3976_v50, %v1607_v15 }
 0x462   :  { %v1611_v48 = vpop.f32.mrb[62].mxu1 }
 0x463   :  { %v1764_v34 = vadd.f32 %v3510_v19, %v1725_v58  ;;  %v1612_v63 = vadd.f32 %v1611_v48, %v3398_v4  ;;  %v1613_v35 = vpop.f32.mrb[63].mxu1 }
 0x465   :  { %1796 = vst.msk [vmem:[%s3743_s9 + $0x50] sm:$0xff] %vm73_vm0, %v1764_v34  ;;  %v1726_v14 = vmul.f32 %v3978_v27, %v1612_v63 }
 0x466   :  { %v1616_v13 = vpop.f32.mrb[64].mxu1 }
 0x467   :  { %v1765_v61 = vadd.f32 %v3510_v19, %v1726_v14  ;;  %v1617_v57 = vadd.f32 %v1616_v13, %v3411_v41  ;;  %v1618_v8 = vpop.f32.mrb[65].mxu1 }
 0x469   :  { %1797 = vst.msk [vmem:[%s3743_s9 + $0x58] sm:$0xff] %vm73_vm0, %v1765_v61  ;;  %v1727_v50 = vmul.f32 %v3979_v45, %v1617_v57 }
 0x46a   :  { %v1621_v4 = vpop.f32.mrb[66].mxu1 }
 0x46b   :  { %v1766_v26 = vadd.f32 %v3510_v19, %v1727_v50  ;;  %v1622_v32 = vadd.f32 %v1621_v4, %v3408_v31  ;;  %v1623_v51 = vpop.f32.mrb[67].mxu1 }
 0x46d   :  { %1798 = vst.msk [vmem:[%s3743_s9 + $0x60] sm:$0xff] %vm73_vm0, %v1766_v26  ;;  %v1728_v27 = vmul.f32 %v3981_v3, %v1622_v32 }
 0x46e   :  { %v1626_v41 = vpop.f32.mrb[68].mxu1 }
 0x46f   :  { %v1767_v18 = vadd.f32 %v3510_v19, %v1728_v27  ;;  %v1627_v40 = vadd.f32 %v1626_v41, %v3421_v25  ;;  %v1628_v52 = vpop.f32.mrb[69].mxu1  ;;  %v4009_v27 = vld [vmem:[#allocation6_spill] sm:$0xff] }
 0x471   :  { %1799 = vst.msk [vmem:[%s3743_s9 + $0x68] sm:$0xff] %vm73_vm0, %v1767_v18  ;;  %v1729_v45 = vmul.f32 %v3982_v22, %v1627_v40 }
 0x472   :  { %v1631_v31 = vpop.f32.mrb[70].mxu1 }
 0x473   :  { %v1768_v54 = vadd.f32 %v3510_v19, %v1729_v45  ;;  %v1632_v24 = vadd.f32 %v1631_v31, %v3418_v12  ;;  %v1633_v29 = vpop.f32.mrb[71].mxu1 }
 0x475   :  { %1800 = vst.msk [vmem:[%s3743_s9 + $0x70] sm:$0xff] %vm73_vm0, %v1768_v54  ;;  %v1730_v3 = vmul.f32 %v3984_v7, %v1632_v24 }
 0x476   :  { %v1636_v25 = vpop.f32.mrb[72].mxu1 }
 0x477   :  { %v1769_v43 = vadd.f32 %v3510_v19, %v1730_v3  ;;  %v1637_v44 = vadd.f32 %v1636_v25, %v3431_v47  ;;  %v1638_v11 = vpop.f32.mrb[73].mxu1  ;;  %v4011_v3 = vld [vmem:[#allocation8_spill] sm:$0xff] }
 0x479   :  { %1801 = vst.msk [vmem:[%s3743_s9 + $0x78] sm:$0xff] %vm73_vm0, %v1769_v43  ;;  %v1731_v22 = vmul.f32 %v3985_v28, %v1637_v44 }
 0x47a   :  { %v1641_v12 = vpop.f32.mrb[74].mxu1 }
 0x47b   :  { %v1770_v20 = vadd.f32 %v3510_v19, %v1731_v22  ;;  %v1642_v10 = vadd.f32 %v1641_v12, %v3428_v16  ;;  %v1643_v38 = vpop.f32.mrb[75].mxu1  ;;  %v4013_v12 = vld [vmem:[#allocation10_spill] sm:$0xff] }
 0x47d   :  { %1802 = vst.msk [vmem:[%s3743_s9 + $0x80] sm:$0xff] %vm73_vm0, %v1770_v20  ;;  %v1732_v7 = vmul.f32 %v3987_v55, %v1642_v10 }
 0x47e   :  { %v1646_v47 = vpop.f32.mrb[76].mxu1 }
 0x47f   :  { %v1771_v30 = vadd.f32 %v3510_v19, %v1732_v7  ;;  %v1647_v9 = vadd.f32 %v1646_v47, %v3441_v49  ;;  %v1648_v56 = vpop.f32.mrb[77].mxu1 }
 0x481   :  { %1803 = vst.msk [vmem:[%s3743_s9 + $0x88] sm:$0xff] %vm73_vm0, %v1771_v30  ;;  %v1733_v28 = vmul.f32 %v3988_v60, %v1647_v9  ;;  %v4015_v30 = vld [vmem:[#allocation7_spill] sm:$0xff] }
 0x482   :  { %v1651_v16 = vpop.f32.mrb[78].mxu1 }
 0x483   :  { %v1772_v17 = vadd.f32 %v3510_v19, %v1733_v28  ;;  %v1652_v23 = vadd.f32 %v1651_v16, %v3438_v33  ;;  %v1653_v39 = vpop.f32.mrb[79].mxu1  ;;  %v4016_v28 = vld [vmem:[#allocation77_spill] sm:$0xff] }
 0x484   :  { %v4017_v39 = vld [vmem:[#allocation12_spill] sm:$0xff] }
 0x485   :  { %1804 = vst.msk [vmem:[%s3743_s9 + $0x90] sm:$0xff] %vm73_vm0, %v1772_v17  ;;  %v1734_v55 = vmul.f32 %v3989_v42, %v1652_v23 }
 0x486   :  { %v1656_v49 = vpop.f32.mrb[80].mxu1 }
 0x487   :  { %v1773_v15 = vadd.f32 %v3510_v19, %v1734_v55  ;;  %v1657_v2 = vadd.f32 %v1656_v49, %v3451_v59  ;;  %v1658_v58 = vpop.f32.mrb[81].mxu1 }
 0x489   :  { %1805 = vst.msk [vmem:[%s3743_s9 + $0x98] sm:$0xff] %vm73_vm0, %v1773_v15  ;;  %v1735_v60 = vmul.f32 %v3990_v36, %v1657_v2  ;;  %v4018_v15 = vld [vmem:[#allocation78_spill] sm:$0xff] }
 0x48a   :  { %v1661_v33 = vpop.f32.mrb[82].mxu1 }
 0x48b   :  { %v1774_v48 = vadd.f32 %v3510_v19, %v1735_v60  ;;  %v1662_v34 = vadd.f32 %v1661_v33, %v3448_v6  ;;  %v1663_v63 = vpop.f32.mrb[83].mxu1  ;;  %v4019_v33 = vld [vmem:[#allocation9_spill] sm:$0xff] }
 0x48c   :  { %v4020_v63 = vld [vmem:[#allocation79_spill] sm:$0xff] }
 0x48d   :  { %1806 = vst.msk [vmem:[%s3743_s9 + $0xa0] sm:$0xff] %vm73_vm0, %v1774_v48  ;;  %v1736_v42 = vmul.f32 %v3991_v37, %v1662_v34  ;;  %v4008_v37 = vld [vmem:[#allocation67_spill] sm:$0xff] }
 0x48e   :  { %v1666_v59 = vpop.f32.mrb[84].mxu1 }
 0x48f   :  { %v1775_v35 = vadd.f32 %v3510_v19, %v1736_v42  ;;  %v1667_v14 = vadd.f32 %v1666_v59, %v3461_v1  ;;  %v1668_v13 = vpop.f32.mrb[85].mxu1 }
 0x491   :  { %1807 = vst.msk [vmem:[%s3743_s9 + $0xa8] sm:$0xff] %vm73_vm0, %v1775_v35  ;;  %v1737_v36 = vmul.f32 %v3992_v0, %v1667_v14 }
 0x492   :  { %v1671_v6 = vpop.f32.mrb[86].mxu1 }
 0x493   :  { %v1776_v61 = vadd.f32 %v3510_v19, %v1737_v36  ;;  %v1672_v57 = vadd.f32 %v1671_v6, %v3458_v21  ;;  %v1673_v8 = vpop.f32.mrb[87].mxu1 }
 0x495   :  { %1808 = vst.msk [vmem:[%s3743_s9 + $0xb0] sm:$0xff] %vm73_vm0, %v1776_v61  ;;  %v1738_v1 = vmul.f32 %v4008_v37, %v1672_v57 }
 0x496   :  { %v1676_v50 = vpop.f32.mrb[88].mxu1 }
 0x497   :  { %v1777_v4 = vadd.f32 %v3510_v19, %v1738_v1  ;;  %v1677_v26 = vadd.f32 %v1676_v50, %v3471_v53  ;;  %v1678_v32 = vpop.f32.mrb[89].mxu1  ;;  %v4010_v53 = vld [vmem:[#allocation70_spill] sm:$0xff] }
 0x499   :  { %1809 = vst.msk [vmem:[%s3743_s9 + $0xb8] sm:$0xff] %vm73_vm0, %v1777_v4  ;;  %v1739_v0 = vmul.f32 %v3996_v46, %v1677_v26 }
 0x49a   :  { %v1681_v21 = vpop.f32.mrb[90].mxu1 }
 0x49b   :  { %v1778_v51 = vadd.f32 %v3510_v19, %v1739_v0  ;;  %v1682_v41 = vadd.f32 %v1681_v21, %v4009_v27  ;;  %v1683_v18 = vpop.f32.mrb[91].mxu1 }
 0x49d   :  { %1810 = vst.msk [vmem:[%s3743_s9 + $0xc0] sm:$0xff] %vm73_vm0, %v1778_v51  ;;  %v1740_v40 = vmul.f32 %v4010_v53, %v1682_v41 }
 0x49e   :  { %v1686_v52 = vpop.f32.mrb[92].mxu1 }
 0x49f   :  { %v1779_v45 = vadd.f32 %v3510_v19, %v1740_v40  ;;  %v1687_v31 = vadd.f32 %v1686_v52, %v3481_v5  ;;  %v1688_v54 = vpop.f32.mrb[93].mxu1  ;;  %v4012_v5 = vld [vmem:[#allocation74_spill] sm:$0xff] }
 0x4a1   :  { %1811 = vst.msk [vmem:[%s3743_s9 + $0xc8] sm:$0xff] %vm73_vm0, %v1779_v45  ;;  %v1741_v46 = vmul.f32 %v3999_v62, %v1687_v31  ;;  %v4014_v62 = vld [vmem:[#allocation75_spill] sm:$0xff] }
 0x4a2   :  { %v1691_v24 = vpop.f32.mrb[94].mxu1 }
 0x4a3   :  { %v1780_v29 = vadd.f32 %v3510_v19, %v1741_v46  ;;  %v1692_v25 = vadd.f32 %v1691_v24, %v4011_v3  ;;  %v1693_v43 = vpop.f32.mrb[95].mxu1 }
 0x4a5   :  { %1812 = vst.msk [vmem:[%s3743_s9 + $0xd0] sm:$0xff] %vm73_vm0, %v1780_v29  ;;  %v1742_v44 = vmul.f32 %v4012_v5, %v1692_v25 }
 0x4a6   :  { %v1696_v11 = vpop.f32.mrb[96].mxu1 }
 0x4a7   :  { %v1781_v22 = vadd.f32 %v3510_v19, %v1742_v44  ;;  %v1697_v20 = vadd.f32 %v1696_v11, %v4013_v12  ;;  %v1698_v10 = vpop.f32.mrb[97].mxu1 }
 0x4a9   :  { %1813 = vst.msk [vmem:[%s3743_s9 + $0xd8] sm:$0xff] %vm73_vm0, %v1781_v22  ;;  %v1743_v38 = vmul.f32 %v4014_v62, %v1697_v20 }
 0x4aa   :  { %v1701_v7 = vpop.f32.mrb[98].mxu1 }
 0x4ab   :  { %v1782_v47 = vadd.f32 %v3510_v19, %v1743_v38  ;;  %v1702_v9 = vadd.f32 %v1701_v7, %v4015_v30  ;;  %v1703_v56 = vpop.f32.mrb[99].mxu1 }
 0x4ad   :  { %1814 = vst.msk [vmem:[%s3743_s9 + $0xe0] sm:$0xff] %vm73_vm0, %v1782_v47  ;;  %v1744_v16 = vmul.f32 %v4016_v28, %v1702_v9 }
 0x4ae   :  { %v1706_v17 = vpop.f32.mrb[100].mxu1 }
 0x4af   :  { %v1783_v23 = vadd.f32 %v3510_v19, %v1744_v16  ;;  %v1707_v55 = vadd.f32 %v1706_v17, %v4017_v39  ;;  %v1708_v49 = vpop.f32.mrb[101].mxu1 }
 0x4b1   :  { %1815 = vst.msk [vmem:[%s3743_s9 + $0xe8] sm:$0xff] %vm73_vm0, %v1783_v23  ;;  %v1745_v2 = vmul.f32 %v4018_v15, %v1707_v55 }
 0x4b2   :  { %v1711_v58 = vpop.f32.mrb[102].mxu1 }
 0x4b3   :  { %v1784_v60 = vadd.f32 %v3510_v19, %v1745_v2  ;;  %v1712_v48 = vadd.f32 %v1711_v58, %v4019_v33  ;;  %v1713_v34 = vpop.f32.mrb[103].mxu1 }
 0x4b5   :  { %1816 = vst.msk [vmem:[%s3743_s9 + $0xf0] sm:$0xff] %vm73_vm0, %v1784_v60  ;;  %v1746_v42 = vmul.f32 %v4020_v63, %v1712_v48 }
 0x4b7   :  { %v1785_v59 = vadd.f32 %v3510_v19, %v1746_v42 }
 0x4b9   :  { %1817 = vst.msk [vmem:[%s3743_s9 + $0xf8] sm:$0xff] %vm73_vm0, %v1785_v59 }
 0x4ba   :  { %1822 = vsyncpa [#allocation4], 1 }

</bundles_post_ra>
